<compile_context>
chip_gen: v7x
topology: tpu7x:2x2x1
jax: 0.10.0
libtpu: 0.0.40
codegen_flags: <defaults>
</compile_context>

<pallas_src>
import functools
import math

import jax
import jax.numpy as jnp
from jax.experimental import pallas as pl
from jax.experimental.pallas import tpu as pltpu


ACT_DTYPE = jnp.bfloat16          # activations / weights (MXU-native)
VMEM_LIMIT = 32 * 1024 * 1024     # explicit scoped-VMEM budget (safe on v5e/v6e/v7x)
_NEG = float(-1e30)               # finite mask value (no -inf -> no NaN risk)


def _pick_tile(dim, target, unit):
    """Largest tile <= target that divides `dim` and is a multiple of `unit`.

    Falls back to the full dim (always a legal block shape)."""
    if dim <= target:
        return dim
    t = target
    while t >= unit:
        if dim % t == 0 and t % unit == 0:
            return t
        t //= 2
    return dim


# ----------------------------- Pallas kernels -----------------------------

def _ln_qkv_kernel(x_ref, g_ref, b_ref, w_ref, bias_ref, o_ref):
    """Fused LayerNorm + one of the Q/K/V projections (grid axis selects which)."""
    x = x_ref[0].astype(jnp.float32)                        # (tm, D)
    mu = jnp.mean(x, axis=-1, keepdims=True)
    var = jnp.mean(jnp.square(x - mu), axis=-1, keepdims=True)
    h = (x - mu) * jax.lax.rsqrt(var + 1e-5)
    h = h * g_ref[...].astype(jnp.float32) + b_ref[...].astype(jnp.float32)
    acc = jnp.dot(h.astype(w_ref.dtype), w_ref[0],
                  preferred_element_type=jnp.float32)       # bf16 MXU, f32 accum
    acc = acc + bias_ref[0].astype(jnp.float32)
    o_ref[0, 0] = acc.astype(o_ref.dtype)


def _ln_matmul_kernel(x_ref, g_ref, b_ref, w_ref, bias_ref, o_ref, *, activation):
    """Fused LayerNorm + Linear (+ optional GELU). Full-K blocks, grid over (M, N)."""
    x = x_ref[...].astype(jnp.float32)
    mu = jnp.mean(x, axis=-1, keepdims=True)
    var = jnp.mean(jnp.square(x - mu), axis=-1, keepdims=True)
    h = (x - mu) * jax.lax.rsqrt(var + 1e-5)
    h = h * g_ref[...].astype(jnp.float32) + b_ref[...].astype(jnp.float32)
    acc = jnp.dot(h.astype(w_ref.dtype), w_ref[...],
                  preferred_element_type=jnp.float32)
    acc = acc + bias_ref[...].astype(jnp.float32)
    if activation == "gelu":
        acc = jax.nn.gelu(acc, approximate=True)
    o_ref[...] = acc.astype(o_ref.dtype)


def _matmul_res_kernel(h_ref, w_ref, bias_ref, res_ref, o_ref, acc_ref):
    """Tiled matmul with K-axis accumulation; bias + residual fused at finalize."""
    @pl.when(pl.program_id(2) == 0)
    def _init():
        acc_ref[...] = jnp.zeros_like(acc_ref)

    acc_ref[...] += jnp.dot(h_ref[...], w_ref[...],
                            preferred_element_type=jnp.float32)

    @pl.when(pl.program_id(2) == pl.num_programs(2) - 1)
    def _finalize():
        out = (acc_ref[...] + bias_ref[...].astype(jnp.float32)
               + res_ref[...].astype(jnp.float32))
        o_ref[...] = out.astype(o_ref.dtype)


def _ln_lm_head_kernel(x_ref, g_ref, b_ref, wte_ref, o_ref):
    """Fused final LayerNorm + weight-tied lm_head; contracts against wte (tn, D)
    over D inside the kernel so wte.T is never materialized in HBM."""
    x = x_ref[...].astype(jnp.float32)
    mu = jnp.mean(x, axis=-1, keepdims=True)
    var = jnp.mean(jnp.square(x - mu), axis=-1, keepdims=True)
    h = (x - mu) * jax.lax.rsqrt(var + 1e-5)
    h = h * g_ref[...].astype(jnp.float32) + b_ref[...].astype(jnp.float32)
    logits = jax.lax.dot_general(
        h.astype(wte_ref.dtype), wte_ref[...],
        dimension_numbers=(((1,), (1,)), ((), ())),
        preferred_element_type=jnp.float32)
    o_ref[...] = logits.astype(o_ref.dtype)


def _flash_attn_kernel(q_ref, k_ref, v_ref, o_ref, m_ref, l_ref, acc_ref,
                       *, n_head, head_dim, tq, tkv):
    """Flash-style causal attention over one (batch, q-block); KV blocks are the
    innermost ("arbitrary") grid axis with online-softmax state in VMEM scratch.
    All heads of a block are processed per step so the HBM-facing blocks stay
    lane-dense (last dim = D)."""
    qi = pl.program_id(1)
    ki = pl.program_id(2)

    @pl.when(ki == 0)
    def _init():
        m_ref[...] = jnp.full_like(m_ref, _NEG)
        l_ref[...] = jnp.zeros_like(l_ref)
        acc_ref[...] = jnp.zeros_like(acc_ref)

    # Skip KV blocks that lie entirely in the causal future of this Q block.
    @pl.when(ki * tkv <= qi * tq + (tq - 1))
    def _compute():
        q = q_ref[0, 0]                                     # (tq, D)   bf16
        k = k_ref[0, 0]                                     # (tkv, D)  bf16
        v = v_ref[0, 0]                                     # (tkv, D)  bf16
        scale = 1.0 / math.sqrt(head_dim)
        # build the causal mask once per KV block, reuse for every head
        rows = qi * tq + jax.lax.broadcasted_iota(jnp.int32, (tq, tkv), 0)
        cols = ki * tkv + jax.lax.broadcasted_iota(jnp.int32, (tq, tkv), 1)
        causal = rows >= cols
        for h in range(n_head):
            sl = slice(h * head_dim, (h + 1) * head_dim)
            s = jax.lax.dot_general(
                q[:, sl], k[:, sl],
                dimension_numbers=(((1,), (1,)), ((), ())),
                preferred_element_type=jnp.float32) * scale
            s = jnp.where(causal, s, _NEG)
            m_prev = m_ref[:, h:h + 1]
            m_new = jnp.maximum(m_prev, jnp.max(s, axis=-1, keepdims=True))
            alpha = jnp.exp(m_prev - m_new)
            p = jnp.exp(s - m_new)
            l_ref[:, h:h + 1] = alpha * l_ref[:, h:h + 1] + jnp.sum(p, axis=-1,
                                                                    keepdims=True)
            acc_ref[:, sl] = alpha * acc_ref[:, sl] + jnp.dot(
                p.astype(v.dtype), v[:, sl], preferred_element_type=jnp.float32)
            m_ref[:, h:h + 1] = m_new

    @pl.when(ki == pl.num_programs(2) - 1)
    def _finalize():
        for h in range(n_head):
            sl = slice(h * head_dim, (h + 1) * head_dim)
            inv = pl.reciprocal(l_ref[:, h:h + 1], approx=True)
            o_ref[0, :, sl] = (acc_ref[:, sl] * inv).astype(o_ref.dtype)


# ----------------------------- Pallas wrappers -----------------------------

def ln_qkv_proj(x, g, b, w_qkv, b_qkv, tm_target=256):
    """x: (B, T, D); w_qkv: (3, D, D); b_qkv: (3, 1, D) -> (3, B, T, D)."""
    B, T, D = x.shape
    tm = _pick_tile(T, tm_target, 8)
    return pl.pallas_call(
        _ln_qkv_kernel,
        out_shape=jax.ShapeDtypeStruct((3, B, T, D), x.dtype),
        grid=(B, T // tm, 3),
        in_specs=[
            pl.BlockSpec((1, tm, D), lambda bb, tt, j: (bb, tt, 0)),
            pl.BlockSpec((1, D), lambda bb, tt, j: (0, 0)),
            pl.BlockSpec((1, D), lambda bb, tt, j: (0, 0)),
            pl.BlockSpec((1, D, D), lambda bb, tt, j: (j, 0, 0)),
            pl.BlockSpec((1, 1, D), lambda bb, tt, j: (j, 0, 0)),
        ],
        out_specs=pl.BlockSpec((1, 1, tm, D), lambda bb, tt, j: (j, bb, tt, 0)),
        compiler_params=pltpu.CompilerParams(
            dimension_semantics=("parallel", "parallel", "parallel"),
            vmem_limit_bytes=VMEM_LIMIT),
    )(x, g.reshape(1, D), b.reshape(1, D), w_qkv, b_qkv)


def flash_causal_attention(qkv, n_head, tq_target=256, tkv_target=256):
    """qkv: (3, B, T, D) -> (B, T, D)."""
    _, B, T, D = qkv.shape
    head_dim = D // n_head
    tq = _pick_tile(T, tq_target, 8)
    tkv = _pick_tile(T, tkv_target, 8)
    kernel = functools.partial(_flash_attn_kernel, n_head=n_head,
                               head_dim=head_dim, tq=tq, tkv=tkv)
    return pl.pallas_call(
        kernel,
        out_shape=jax.ShapeDtypeStruct((B, T, D), qkv.dtype),
        grid=(B, T // tq, T // tkv),
        in_specs=[
            pl.BlockSpec((1, 1, tq, D), lambda bb, qi, ki: (0, bb, qi, 0)),
            pl.BlockSpec((1, 1, tkv, D), lambda bb, qi, ki: (1, bb, ki, 0)),
            pl.BlockSpec((1, 1, tkv, D), lambda bb, qi, ki: (2, bb, ki, 0)),
        ],
        out_specs=pl.BlockSpec((1, tq, D), lambda bb, qi, ki: (bb, qi, 0)),
        scratch_shapes=[
            pltpu.VMEM((tq, n_head), jnp.float32),   # running max m
            pltpu.VMEM((tq, n_head), jnp.float32),   # running denom l
            pltpu.VMEM((tq, D), jnp.float32),        # output accumulator
        ],
        compiler_params=pltpu.CompilerParams(
            dimension_semantics=("parallel", "parallel", "arbitrary"),
            vmem_limit_bytes=VMEM_LIMIT),
    )(qkv, qkv, qkv)


def ln_linear(x, g, b, w, bias, activation="none", tm_target=256, tn_target=256):
    """Fused LN + Linear (+GELU). x: (M, K); w: (K, N) -> (M, N)."""
    M, K = x.shape
    _, N = w.shape
    tm = _pick_tile(M, tm_target, 8)
    tn = _pick_tile(N, tn_target, 128)
    kernel = functools.partial(_ln_matmul_kernel, activation=activation)
    return pl.pallas_call(
        kernel,
        out_shape=jax.ShapeDtypeStruct((M, N), x.dtype),
        grid=(M // tm, N // tn),
        in_specs=[
            pl.BlockSpec((tm, K), lambda i, j: (i, 0)),
            pl.BlockSpec((1, K), lambda i, j: (0, 0)),
            pl.BlockSpec((1, K), lambda i, j: (0, 0)),
            pl.BlockSpec((K, tn), lambda i, j: (0, j)),
            pl.BlockSpec((1, tn), lambda i, j: (0, j)),
        ],
        out_specs=pl.BlockSpec((tm, tn), lambda i, j: (i, j)),
        compiler_params=pltpu.CompilerParams(
            dimension_semantics=("parallel", "parallel"),
            vmem_limit_bytes=VMEM_LIMIT),
    )(x, g.reshape(1, K), b.reshape(1, K), w, bias.reshape(1, N))


def matmul_bias_residual(h, w, bias, res, tm_target=256, tn_target=256,
                         tk_target=512):
    """out = res + h @ w + bias, tiled over (M, N, K) with an f32 VMEM accumulator."""
    M, K = h.shape
    _, N = w.shape
    tm = _pick_tile(M, tm_target, 8)
    tn = _pick_tile(N, tn_target, 128)
    tk = _pick_tile(K, tk_target, 128)
    return pl.pallas_call(
        _matmul_res_kernel,
        out_shape=jax.ShapeDtypeStruct((M, N), res.dtype),
        grid=(M // tm, N // tn, K // tk),
        in_specs=[
            pl.BlockSpec((tm, tk), lambda i, j, k: (i, k)),
            pl.BlockSpec((tk, tn), lambda i, j, k: (k, j)),
            pl.BlockSpec((1, tn), lambda i, j, k: (0, j)),
            pl.BlockSpec((tm, tn), lambda i, j, k: (i, j)),
        ],
        out_specs=pl.BlockSpec((tm, tn), lambda i, j, k: (i, j)),
        scratch_shapes=[pltpu.VMEM((tm, tn), jnp.float32)],
        compiler_params=pltpu.CompilerParams(
            dimension_semantics=("parallel", "parallel", "arbitrary"),
            vmem_limit_bytes=VMEM_LIMIT),
    )(h, w, bias.reshape(1, N), res)


def ln_lm_head(x, g, b, wte, tm_target=256, tn_target=512):
    """Fused final LN + weight-tied lm_head. x: (M, D); wte: (V, D) -> (M, V) f32.
    Note: for best tiling, V should be padded to a multiple of 128 at real scale."""
    M, D = x.shape
    V, _ = wte.shape
    tm = _pick_tile(M, tm_target, 8)
    tn = _pick_tile(V, tn_target, 128)
    return pl.pallas_call(
        _ln_lm_head_kernel,
        out_shape=jax.ShapeDtypeStruct((M, V), jnp.float32),
        grid=(M // tm, V // tn),
        in_specs=[
            pl.BlockSpec((tm, D), lambda i, j: (i, 0)),
            pl.BlockSpec((1, D), lambda i, j: (0, 0)),
            pl.BlockSpec((1, D), lambda i, j: (0, 0)),
            pl.BlockSpec((tn, D), lambda i, j: (j, 0)),
        ],
        out_specs=pl.BlockSpec((tm, tn), lambda i, j: (i, j)),
        compiler_params=pltpu.CompilerParams(
            dimension_semantics=("parallel", "parallel"),
            vmem_limit_bytes=VMEM_LIMIT),
    )(x, g.reshape(1, D), b.reshape(1, D), wte)


# ----------------------------- Model (glue + params) -----------------------------

def sinusoidal_pe(max_len, d_model):
    pos = jnp.arange(max_len, dtype=jnp.float32)[:, None]
    div = jnp.exp(jnp.arange(0, d_model, 2, dtype=jnp.float32)
                  * (-math.log(10000.0) / d_model))
    pe = jnp.zeros((max_len, d_model), dtype=jnp.float32)
    pe = pe.at[:, 0::2].set(jnp.sin(pos * div))
    pe = pe.at[:, 1::2].set(jnp.cos(pos * div))
    return pe


def init_params(key, vocab_size, block_size, n_embd, n_head, n_layer, mlp_dim,
                dtype=ACT_DTYPE):
    std = 0.02
    cproj_std = 0.02 / math.sqrt(2 * n_layer)
    keys = jax.random.split(key, 1 + 4 * n_layer)
    ki = iter(keys)

    def normal(k, shape, s):
        return (s * jax.random.normal(k, shape, jnp.float32)).astype(dtype)

    params = {
        "wte": normal(next(ki), (vocab_size, n_embd), std),       # tied with lm_head
        "pe": sinusoidal_pe(block_size, n_embd),
        "ln_f_g": jnp.ones((n_embd,), jnp.float32),
        "ln_f_b": jnp.zeros((n_embd,), jnp.float32),
        "layers": [],
    }
    for _ in range(n_layer):
        layer = {
            "ln1_g": jnp.ones((n_embd,), jnp.float32),
            "ln1_b": jnp.zeros((n_embd,), jnp.float32),
            # QKV weight stored stacked (3, D, D) [in, out] so the fused kernel
            # can read per-component (D, D) blocks directly.
            "attn_w": normal(next(ki), (3, n_embd, n_embd), std),
            "attn_b": jnp.zeros((3, 1, n_embd), jnp.float32),
            "attn_proj_w": normal(next(ki), (n_embd, n_embd), cproj_std),
            "attn_proj_b": jnp.zeros((n_embd,), jnp.float32),
            "ln2_g": jnp.ones((n_embd,), jnp.float32),
            "ln2_b": jnp.zeros((n_embd,), jnp.float32),
            "fc_w": normal(next(ki), (n_embd, mlp_dim), std),
            "fc_b": jnp.zeros((mlp_dim,), jnp.float32),
            "mlp_proj_w": normal(next(ki), (mlp_dim, n_embd), cproj_std),
            "mlp_proj_b": jnp.zeros((n_embd,), jnp.float32),
        }
        params["layers"].append(layer)
    return params


def transformer_block(p, x, n_head):
    B, T, D = x.shape
    M = B * T
    x2 = x.reshape(M, D)

    # pre-LN causal self-attention: LN1+QKV fused, flash attention, c_proj+residual fused
    qkv = ln_qkv_proj(x, p["ln1_g"], p["ln1_b"], p["attn_w"], p["attn_b"])   # (3,B,T,D)
    a = flash_causal_attention(qkv, n_head)                                   # (B,T,D)
    x2 = matmul_bias_residual(a.reshape(M, D), p["attn_proj_w"],
                              p["attn_proj_b"], x2)

    # pre-LN MLP: LN2+fc+GELU fused, c_proj+residual fused
    h = ln_linear(x2, p["ln2_g"], p["ln2_b"], p["fc_w"], p["fc_b"],
                  activation="gelu")
    x2 = matmul_bias_residual(h, p["mlp_proj_w"], p["mlp_proj_b"], x2)

    return x2.reshape(B, T, D)


def gpt_forward(params, idx, n_head, block_size):
    B, T = idx.shape
    assert T <= block_size
    V, D = params["wte"].shape

    # embedding gather stays in XLA glue (data-dependent gather).
    tok = jnp.take(params["wte"], idx, axis=0).astype(jnp.float32)   # (B, T, D)
    x = (tok + params["pe"][:T][None, :, :]).astype(ACT_DTYPE)       # drop() = identity

    for layer in params["layers"]:
        x = transformer_block(layer, x, n_head)

    logits = ln_lm_head(x.reshape(B * T, D), params["ln_f_g"], params["ln_f_b"],
                        params["wte"])                                # weight-tied
    logits = logits.reshape(B, T, V)
    # TODO(synk): cross_entropy loss path (targets is not None) not implemented; returns loss=None.
    return logits, None


# ----------------------------- Pure-JAX reference (for correctness check) ---------

def reference_forward(params, idx, n_head):
    f32 = jnp.float32
    wte = params["wte"].astype(f32)
    B, T = idx.shape
    D = wte.shape[1]
    Dh = D // n_head

    def ln(x, g, b):
        mu = x.mean(-1, keepdims=True)
        var = ((x - mu) ** 2).mean(-1, keepdims=True)
        return (x - mu) * jax.lax.rsqrt(var + 1e-5) * g + b

    x = jnp.take(wte, idx, axis=0) + params["pe"][:T][None]
    for p in params["layers"]:
        h = ln(x, p["ln1_g"], p["ln1_b"])
        w = p["attn_w"].astype(f32)
        q = (h @ w[0] + p["attn_b"][0, 0]).reshape(B, T, n_head, Dh).transpose(0, 2, 1, 3)
        k = (h @ w[1] + p["attn_b"][1, 0]).reshape(B, T, n_head, Dh).transpose(0, 2, 1, 3)
        v = (h @ w[2] + p["attn_b"][2, 0]).reshape(B, T, n_head, Dh).transpose(0, 2, 1, 3)
        s = jnp.einsum("bhqd,bhkd->bhqk", q, k) / math.sqrt(Dh)
        mask = jnp.tril(jnp.ones((T, T), bool))
        s = jnp.where(mask, s, -jnp.inf)
        a = jnp.einsum("bhqk,bhkd->bhqd", jax.nn.softmax(s, axis=-1), v)
        a = a.transpose(0, 2, 1, 3).reshape(B, T, D)
        x = x + a @ p["attn_proj_w"].astype(f32) + p["attn_proj_b"]
        h2 = ln(x, p["ln2_g"], p["ln2_b"])
        m = jax.nn.gelu(h2 @ p["fc_w"].astype(f32) + p["fc_b"], approximate=True)
        x = x + m @ p["mlp_proj_w"].astype(f32) + p["mlp_proj_b"]
    x = ln(x, params["ln_f_g"], params["ln_f_b"])
    return x @ wte.T


# ----------------------------- Main -----------------------------

if __name__ == "__main__":
    vocab_size, block_size = 128, 16
    n_embd, n_head, n_layer, mlp_dim = 32, 4, 2, 64
    batch, seq = 2, 8

    key = jax.random.PRNGKey(0)
    pkey, dkey = jax.random.split(key)
    params = init_params(pkey, vocab_size, block_size, n_embd, n_head, n_layer, mlp_dim)
    idx = jax.random.randint(dkey, (batch, seq), 0, vocab_size, dtype=jnp.int32)

    fwd = jax.jit(gpt_forward, static_argnums=(2, 3))
    logits, loss = fwd(params, idx, n_head, block_size)
    logits = jax.block_until_ready(logits)

    assert logits.shape == (batch, seq, vocab_size)
    assert bool(jnp.all(jnp.isfinite(logits)))

    ref = reference_forward(params, idx, n_head)
    max_err = float(jnp.max(jnp.abs(logits.astype(jnp.float32) - ref)))
    assert max_err < 5e-2, f"mismatch vs reference: {max_err}"

    print("KERNEL_OK")
</pallas_src>

<mosaic_0001>
module attributes {stable_mosaic.version = 11 : i64} {
  func.func @_flash_attn_kernel(%arg0: i32, %arg1: i32, %arg2: i32, %arg3: memref<1x1x8x32xbf16, #tpu.memory_space<vmem>>, %arg4: memref<1x1x8x32xbf16, #tpu.memory_space<vmem>>, %arg5: memref<1x1x8x32xbf16, #tpu.memory_space<vmem>>, %arg6: memref<1x8x32xbf16, #tpu.memory_space<vmem>>, %arg7: memref<8x4xf32, #tpu.memory_space<vmem>>, %arg8: memref<8x4xf32, #tpu.memory_space<vmem>>, %arg9: memref<8x32xf32, #tpu.memory_space<vmem>>) attributes {dimension_semantics = [#tpu.dimension_semantics<parallel>, #tpu.dimension_semantics<parallel>, #tpu.dimension_semantics<arbitrary>], iteration_bounds = array<i64: 2, 1, 1>, scalar_prefetch = 0 : i64, scratch_operands = 3 : i64, tpu.core_type = #tpu.core_type<tc>, window_params = [{transform_indices = @transform_0, window_bounds = array<i64: 1, 1, 8, 32>}, {transform_indices = @transform_1, window_bounds = array<i64: 1, 1, 8, 32>}, {transform_indices = @transform_2, window_bounds = array<i64: 1, 1, 8, 32>}, {transform_indices = @transform_3, window_bounds = array<i64: 1, 8, 32>}]} {
    %c0_i32 = arith.constant 0 : i32
    %0 = arith.cmpi eq, %arg2, %c0_i32 : i32
    %1 = arith.extui %0 : i1 to i32
    %c0_i32_0 = arith.constant 0 : i32
    %2 = arith.cmpi ne, %1, %c0_i32_0 : i32
    scf.if %2 {
      %cst = arith.constant -1.000000e+30 : f32
      %12 = vector.broadcast %cst : f32 to vector<8x4xf32>
      %c0 = arith.constant 0 : index
      %c0_5 = arith.constant 0 : index
      %13 = vector.load %arg7[%c0, %c0_5] : memref<8x4xf32, #tpu.memory_space<vmem>>, vector<8x4xf32>
      tpu.vector_store %arg7[%c0, %c0_5], %12 {strides = array<i32>} : memref<8x4xf32, #tpu.memory_space<vmem>>, vector<8x4xf32>,
      %cst_6 = arith.constant 0.000000e+00 : f32
      %14 = vector.broadcast %cst_6 : f32 to vector<8x4xf32>
      %c0_7 = arith.constant 0 : index
      %c0_8 = arith.constant 0 : index
      %15 = vector.load %arg8[%c0_7, %c0_8] : memref<8x4xf32, #tpu.memory_space<vmem>>, vector<8x4xf32>
      tpu.vector_store %arg8[%c0_7, %c0_8], %14 {strides = array<i32>} : memref<8x4xf32, #tpu.memory_space<vmem>>, vector<8x4xf32>,
      %cst_9 = arith.constant 0.000000e+00 : f32
      %16 = vector.broadcast %cst_9 : f32 to vector<8x32xf32>
      %c0_10 = arith.constant 0 : index
      %c0_11 = arith.constant 0 : index
      %17 = vector.load %arg9[%c0_10, %c0_11] : memref<8x32xf32, #tpu.memory_space<vmem>>, vector<8x32xf32>
      tpu.vector_store %arg9[%c0_10, %c0_11], %16 {strides = array<i32>} : memref<8x32xf32, #tpu.memory_space<vmem>>, vector<8x32xf32>,
    } else {
    }
    %c8_i32 = arith.constant 8 : i32
    %3 = arith.muli %arg2, %c8_i32 : i32
    %c8_i32_1 = arith.constant 8 : i32
    %4 = arith.muli %arg1, %c8_i32_1 : i32
    %c7_i32 = arith.constant 7 : i32
    %5 = arith.addi %4, %c7_i32 : i32
    %6 = arith.cmpi sle, %3, %5 : i32
    %7 = arith.extui %6 : i1 to i32
    %c0_i32_2 = arith.constant 0 : i32
    %8 = arith.cmpi ne, %7, %c0_i32_2 : i32
    scf.if %8 {
      %c0 = arith.constant 0 : index
      %c0_5 = arith.constant 0 : index
      %c0_6 = arith.constant 0 : index
      %c0_7 = arith.constant 0 : index
      %12 = vector.load %arg3[%c0, %c0_5, %c0_6, %c0_7] : memref<1x1x8x32xbf16, #tpu.memory_space<vmem>>, vector<1x1x8x32xbf16>
      %13 = vector.shape_cast %12 : vector<1x1x8x32xbf16> to vector<8x32xbf16>
      %c0_8 = arith.constant 0 : index
      %c0_9 = arith.constant 0 : index
      %c0_10 = arith.constant 0 : index
      %c0_11 = arith.constant 0 : index
      %14 = vector.load %arg4[%c0_8, %c0_9, %c0_10, %c0_11] : memref<1x1x8x32xbf16, #tpu.memory_space<vmem>>, vector<1x1x8x32xbf16>
      %15 = vector.shape_cast %14 : vector<1x1x8x32xbf16> to vector<8x32xbf16>
      %c0_12 = arith.constant 0 : index
      %c0_13 = arith.constant 0 : index
      %c0_14 = arith.constant 0 : index
      %c0_15 = arith.constant 0 : index
      %16 = vector.load %arg5[%c0_12, %c0_13, %c0_14, %c0_15] : memref<1x1x8x32xbf16, #tpu.memory_space<vmem>>, vector<1x1x8x32xbf16>
      %17 = vector.shape_cast %16 : vector<1x1x8x32xbf16> to vector<8x32xbf16>
      %c8_i32_16 = arith.constant 8 : i32
      %18 = arith.muli %arg1, %c8_i32_16 : i32
      %19 = tpu.iota {dimensions = array<i32: 0>} : vector<8x8xi32>
      %20 = vector.broadcast %18 : i32 to vector<8x8xi32>
      %21 = arith.addi %20, %19 : vector<8x8xi32>
      %c8_i32_17 = arith.constant 8 : i32
      %22 = arith.muli %arg2, %c8_i32_17 : i32
      %23 = tpu.iota {dimensions = array<i32: 1>} : vector<8x8xi32>
      %24 = vector.broadcast %22 : i32 to vector<8x8xi32>
      %25 = arith.addi %24, %23 : vector<8x8xi32>
      %26 = arith.cmpi sge, %21, %25 : vector<8x8xi32>
      %27 = vector.extract_strided_slice %13 {offsets = [0, 0], sizes = [8, 8], strides = [1, 1]} : vector<8x32xbf16> to vector<8x8xbf16>
      %28 = vector.extract_strided_slice %15 {offsets = [0, 0], sizes = [8, 8], strides = [1, 1]} : vector<8x32xbf16> to vector<8x8xbf16>
      %cst = arith.constant dense<0.000000e+00> : vector<8x8xf32>
      %29 = tpu.matmul %27, %28, %cst {dimension_numbers = #tpu.dot_dimension_numbers<[1], [1], [0], [0], [0, 0, 1, 0], [], []>} : vector<8x8xbf16>, vector<8x8xbf16>, vector<8x8xf32> -> vector<8x8xf32>
      %cst_18 = arith.constant 0.353553385 : f32
      %30 = vector.broadcast %cst_18 : f32 to vector<8x8xf32>
      %31 = arith.mulf %29, %30 : vector<8x8xf32>
      %cst_19 = arith.constant -1.000000e+30 : f32
      %32 = vector.broadcast %cst_19 : f32 to vector<8x8xf32>
      %33 = arith.select %26, %31, %32 : vector<8x8xi1>, vector<8x8xf32>
      %c0_20 = arith.constant 0 : index
      %c0_21 = arith.constant 0 : index
      %34 = vector.load %arg7[%c0_20, %c0_21] : memref<8x4xf32, #tpu.memory_space<vmem>>, vector<8x1xf32>
      %cst_22 = arith.constant dense<0xFF800000> : vector<8xf32>
      %35 = vector.multi_reduction <maximumf>, %33, %cst_22 [1] : vector<8x8xf32> to vector<8xf32>
      %36 = vector.shape_cast %35 : vector<8xf32> to vector<8x1xf32>
      %37 = arith.maximumf %34, %36 : vector<8x1xf32>
      %38 = arith.subf %34, %37 : vector<8x1xf32>
      %39 = math.exp %38 : vector<8x1xf32>
      %40 = vector.broadcast %37 : vector<8x1xf32> to vector<8x8xf32>
      %41 = arith.subf %33, %40 : vector<8x8xf32>
      %42 = math.exp %41 : vector<8x8xf32>
      %c0_23 = arith.constant 0 : index
      %c0_24 = arith.constant 0 : index
      %43 = vector.load %arg8[%c0_23, %c0_24] : memref<8x4xf32, #tpu.memory_space<vmem>>, vector<8x1xf32>
      %44 = arith.mulf %39, %43 : vector<8x1xf32>
      %cst_25 = arith.constant dense<0.000000e+00> : vector<8xf32>
      %45 = vector.multi_reduction <add>, %42, %cst_25 [1] : vector<8x8xf32> to vector<8xf32>
      %46 = vector.shape_cast %45 : vector<8xf32> to vector<8x1xf32>
      %47 = arith.addf %44, %46 : vector<8x1xf32>
      %c0_26 = arith.constant 0 : index
      %c0_27 = arith.constant 0 : index
      %48 = vector.load %arg8[%c0_26, %c0_27] : memref<8x4xf32, #tpu.memory_space<vmem>>, vector<8x1xf32>
      tpu.vector_store %arg8[%c0_26, %c0_27], %47 {strides = array<i32>} : memref<8x4xf32, #tpu.memory_space<vmem>>, vector<8x1xf32>,
      %c0_28 = arith.constant 0 : index
      %c0_29 = arith.constant 0 : index
      %49 = vector.load %arg9[%c0_28, %c0_29] : memref<8x32xf32, #tpu.memory_space<vmem>>, vector<8x8xf32>
      %50 = vector.broadcast %39 : vector<8x1xf32> to vector<8x8xf32>
      %51 = arith.mulf %50, %49 : vector<8x8xf32>
      %52 = arith.truncf %42 : vector<8x8xf32> to vector<8x8xbf16>
      %53 = vector.extract_strided_slice %17 {offsets = [0, 0], sizes = [8, 8], strides = [1, 1]} : vector<8x32xbf16> to vector<8x8xbf16>
      %cst_30 = arith.constant dense<0.000000e+00> : vector<8x8xf32>
      %54 = tpu.matmul %52, %53, %cst_30 {dimension_numbers = #tpu.dot_dimension_numbers<[1], [0], [0], [1], [0, 0, 1, 1], [], []>} : vector<8x8xbf16>, vector<8x8xbf16>, vector<8x8xf32> -> vector<8x8xf32>
      %55 = arith.addf %51, %54 : vector<8x8xf32>
      %c0_31 = arith.constant 0 : index
      %c0_32 = arith.constant 0 : index
      %56 = vector.load %arg9[%c0_31, %c0_32] : memref<8x32xf32, #tpu.memory_space<vmem>>, vector<8x8xf32>
      tpu.vector_store %arg9[%c0_31, %c0_32], %55 {strides = array<i32>} : memref<8x32xf32, #tpu.memory_space<vmem>>, vector<8x8xf32>,
      %c0_33 = arith.constant 0 : index
      %c0_34 = arith.constant 0 : index
      %57 = vector.load %arg7[%c0_33, %c0_34] : memref<8x4xf32, #tpu.memory_space<vmem>>, vector<8x1xf32>
      tpu.vector_store %arg7[%c0_33, %c0_34], %37 {strides = array<i32>} : memref<8x4xf32, #tpu.memory_space<vmem>>, vector<8x1xf32>,
      %58 = vector.extract_strided_slice %13 {offsets = [0, 8], sizes = [8, 8], strides = [1, 1]} : vector<8x32xbf16> to vector<8x8xbf16>
      %59 = vector.extract_strided_slice %15 {offsets = [0, 8], sizes = [8, 8], strides = [1, 1]} : vector<8x32xbf16> to vector<8x8xbf16>
      %cst_35 = arith.constant dense<0.000000e+00> : vector<8x8xf32>
      %60 = tpu.matmul %58, %59, %cst_35 {dimension_numbers = #tpu.dot_dimension_numbers<[1], [1], [0], [0], [0, 0, 1, 0], [], []>} : vector<8x8xbf16>, vector<8x8xbf16>, vector<8x8xf32> -> vector<8x8xf32>
      %cst_36 = arith.constant 0.353553385 : f32
      %61 = vector.broadcast %cst_36 : f32 to vector<8x8xf32>
      %62 = arith.mulf %60, %61 : vector<8x8xf32>
      %cst_37 = arith.constant -1.000000e+30 : f32
      %63 = vector.broadcast %cst_37 : f32 to vector<8x8xf32>
      %64 = arith.select %26, %62, %63 : vector<8x8xi1>, vector<8x8xf32>
      %c0_38 = arith.constant 0 : index
      %c1 = arith.constant 1 : index
      %65 = vector.load %arg7[%c0_38, %c1] : memref<8x4xf32, #tpu.memory_space<vmem>>, vector<8x1xf32>
      %cst_39 = arith.constant dense<0xFF800000> : vector<8xf32>
      %66 = vector.multi_reduction <maximumf>, %64, %cst_39 [1] : vector<8x8xf32> to vector<8xf32>
      %67 = vector.shape_cast %66 : vector<8xf32> to vector<8x1xf32>
      %68 = arith.maximumf %65, %67 : vector<8x1xf32>
      %69 = arith.subf %65, %68 : vector<8x1xf32>
      %70 = math.exp %69 : vector<8x1xf32>
      %71 = vector.broadcast %68 : vector<8x1xf32> to vector<8x8xf32>
      %72 = arith.subf %64, %71 : vector<8x8xf32>
      %73 = math.exp %72 : vector<8x8xf32>
      %c0_40 = arith.constant 0 : index
      %c1_41 = arith.constant 1 : index
      %74 = vector.load %arg8[%c0_40, %c1_41] : memref<8x4xf32, #tpu.memory_space<vmem>>, vector<8x1xf32>
      %75 = arith.mulf %70, %74 : vector<8x1xf32>
      %cst_42 = arith.constant dense<0.000000e+00> : vector<8xf32>
      %76 = vector.multi_reduction <add>, %73, %cst_42 [1] : vector<8x8xf32> to vector<8xf32>
      %77 = vector.shape_cast %76 : vector<8xf32> to vector<8x1xf32>
      %78 = arith.addf %75, %77 : vector<8x1xf32>
      %c0_43 = arith.constant 0 : index
      %c1_44 = arith.constant 1 : index
      %79 = vector.load %arg8[%c0_43, %c1_44] : memref<8x4xf32, #tpu.memory_space<vmem>>, vector<8x1xf32>
      tpu.vector_store %arg8[%c0_43, %c1_44], %78 {strides = array<i32>} : memref<8x4xf32, #tpu.memory_space<vmem>>, vector<8x1xf32>,
      %c0_45 = arith.constant 0 : index
      %c8 = arith.constant 8 : index
      %80 = vector.load %arg9[%c0_45, %c8] : memref<8x32xf32, #tpu.memory_space<vmem>>, vector<8x8xf32>
      %81 = vector.broadcast %70 : vector<8x1xf32> to vector<8x8xf32>
      %82 = arith.mulf %81, %80 : vector<8x8xf32>
      %83 = arith.truncf %73 : vector<8x8xf32> to vector<8x8xbf16>
      %84 = vector.extract_strided_slice %17 {offsets = [0, 8], sizes = [8, 8], strides = [1, 1]} : vector<8x32xbf16> to vector<8x8xbf16>
      %cst_46 = arith.constant dense<0.000000e+00> : vector<8x8xf32>
      %85 = tpu.matmul %83, %84, %cst_46 {dimension_numbers = #tpu.dot_dimension_numbers<[1], [0], [0], [1], [0, 0, 1, 1], [], []>} : vector<8x8xbf16>, vector<8x8xbf16>, vector<8x8xf32> -> vector<8x8xf32>
      %86 = arith.addf %82, %85 : vector<8x8xf32>
      %c0_47 = arith.constant 0 : index
      %c8_48 = arith.constant 8 : index
      %87 = vector.load %arg9[%c0_47, %c8_48] : memref<8x32xf32, #tpu.memory_space<vmem>>, vector<8x8xf32>
      tpu.vector_store %arg9[%c0_47, %c8_48], %86 {strides = array<i32>} : memref<8x32xf32, #tpu.memory_space<vmem>>, vector<8x8xf32>,
      %c0_49 = arith.constant 0 : index
      %c1_50 = arith.constant 1 : index
      %88 = vector.load %arg7[%c0_49, %c1_50] : memref<8x4xf32, #tpu.memory_space<vmem>>, vector<8x1xf32>
      tpu.vector_store %arg7[%c0_49, %c1_50], %68 {strides = array<i32>} : memref<8x4xf32, #tpu.memory_space<vmem>>, vector<8x1xf32>,
      %89 = vector.extract_strided_slice %13 {offsets = [0, 16], sizes = [8, 8], strides = [1, 1]} : vector<8x32xbf16> to vector<8x8xbf16>
      %90 = vector.extract_strided_slice %15 {offsets = [0, 16], sizes = [8, 8], strides = [1, 1]} : vector<8x32xbf16> to vector<8x8xbf16>
      %cst_51 = arith.constant dense<0.000000e+00> : vector<8x8xf32>
      %91 = tpu.matmul %89, %90, %cst_51 {dimension_numbers = #tpu.dot_dimension_numbers<[1], [1], [0], [0], [0, 0, 1, 0], [], []>} : vector<8x8xbf16>, vector<8x8xbf16>, vector<8x8xf32> -> vector<8x8xf32>
      %cst_52 = arith.constant 0.353553385 : f32
      %92 = vector.broadcast %cst_52 : f32 to vector<8x8xf32>
      %93 = arith.mulf %91, %92 : vector<8x8xf32>
      %cst_53 = arith.constant -1.000000e+30 : f32
      %94 = vector.broadcast %cst_53 : f32 to vector<8x8xf32>
      %95 = arith.select %26, %93, %94 : vector<8x8xi1>, vector<8x8xf32>
      %c0_54 = arith.constant 0 : index
      %c2 = arith.constant 2 : index
      %96 = vector.load %arg7[%c0_54, %c2] : memref<8x4xf32, #tpu.memory_space<vmem>>, vector<8x1xf32>
      %cst_55 = arith.constant dense<0xFF800000> : vector<8xf32>
      %97 = vector.multi_reduction <maximumf>, %95, %cst_55 [1] : vector<8x8xf32> to vector<8xf32>
      %98 = vector.shape_cast %97 : vector<8xf32> to vector<8x1xf32>
      %99 = arith.maximumf %96, %98 : vector<8x1xf32>
      %100 = arith.subf %96, %99 : vector<8x1xf32>
      %101 = math.exp %100 : vector<8x1xf32>
      %102 = vector.broadcast %99 : vector<8x1xf32> to vector<8x8xf32>
      %103 = arith.subf %95, %102 : vector<8x8xf32>
      %104 = math.exp %103 : vector<8x8xf32>
      %c0_56 = arith.constant 0 : index
      %c2_57 = arith.constant 2 : index
      %105 = vector.load %arg8[%c0_56, %c2_57] : memref<8x4xf32, #tpu.memory_space<vmem>>, vector<8x1xf32>
      %106 = arith.mulf %101, %105 : vector<8x1xf32>
      %cst_58 = arith.constant dense<0.000000e+00> : vector<8xf32>
      %107 = vector.multi_reduction <add>, %104, %cst_58 [1] : vector<8x8xf32> to vector<8xf32>
      %108 = vector.shape_cast %107 : vector<8xf32> to vector<8x1xf32>
      %109 = arith.addf %106, %108 : vector<8x1xf32>
      %c0_59 = arith.constant 0 : index
      %c2_60 = arith.constant 2 : index
      %110 = vector.load %arg8[%c0_59, %c2_60] : memref<8x4xf32, #tpu.memory_space<vmem>>, vector<8x1xf32>
      tpu.vector_store %arg8[%c0_59, %c2_60], %109 {strides = array<i32>} : memref<8x4xf32, #tpu.memory_space<vmem>>, vector<8x1xf32>,
      %c0_61 = arith.constant 0 : index
      %c16 = arith.constant 16 : index
      %111 = vector.load %arg9[%c0_61, %c16] : memref<8x32xf32, #tpu.memory_space<vmem>>, vector<8x8xf32>
      %112 = vector.broadcast %101 : vector<8x1xf32> to vector<8x8xf32>
      %113 = arith.mulf %112, %111 : vector<8x8xf32>
      %114 = arith.truncf %104 : vector<8x8xf32> to vector<8x8xbf16>
      %115 = vector.extract_strided_slice %17 {offsets = [0, 16], sizes = [8, 8], strides = [1, 1]} : vector<8x32xbf16> to vector<8x8xbf16>
      %cst_62 = arith.constant dense<0.000000e+00> : vector<8x8xf32>
      %116 = tpu.matmul %114, %115, %cst_62 {dimension_numbers = #tpu.dot_dimension_numbers<[1], [0], [0], [1], [0, 0, 1, 1], [], []>} : vector<8x8xbf16>, vector<8x8xbf16>, vector<8x8xf32> -> vector<8x8xf32>
      %117 = arith.addf %113, %116 : vector<8x8xf32>
      %c0_63 = arith.constant 0 : index
      %c16_64 = arith.constant 16 : index
      %118 = vector.load %arg9[%c0_63, %c16_64] : memref<8x32xf32, #tpu.memory_space<vmem>>, vector<8x8xf32>
      tpu.vector_store %arg9[%c0_63, %c16_64], %117 {strides = array<i32>} : memref<8x32xf32, #tpu.memory_space<vmem>>, vector<8x8xf32>,
      %c0_65 = arith.constant 0 : index
      %c2_66 = arith.constant 2 : index
      %119 = vector.load %arg7[%c0_65, %c2_66] : memref<8x4xf32, #tpu.memory_space<vmem>>, vector<8x1xf32>
      tpu.vector_store %arg7[%c0_65, %c2_66], %99 {strides = array<i32>} : memref<8x4xf32, #tpu.memory_space<vmem>>, vector<8x1xf32>,
      %120 = vector.extract_strided_slice %13 {offsets = [0, 24], sizes = [8, 8], strides = [1, 1]} : vector<8x32xbf16> to vector<8x8xbf16>
      %121 = vector.extract_strided_slice %15 {offsets = [0, 24], sizes = [8, 8], strides = [1, 1]} : vector<8x32xbf16> to vector<8x8xbf16>
      %cst_67 = arith.constant dense<0.000000e+00> : vector<8x8xf32>
      %122 = tpu.matmul %120, %121, %cst_67 {dimension_numbers = #tpu.dot_dimension_numbers<[1], [1], [0], [0], [0, 0, 1, 0], [], []>} : vector<8x8xbf16>, vector<8x8xbf16>, vector<8x8xf32> -> vector<8x8xf32>
      %cst_68 = arith.constant 0.353553385 : f32
      %123 = vector.broadcast %cst_68 : f32 to vector<8x8xf32>
      %124 = arith.mulf %122, %123 : vector<8x8xf32>
      %cst_69 = arith.constant -1.000000e+30 : f32
      %125 = vector.broadcast %cst_69 : f32 to vector<8x8xf32>
      %126 = arith.select %26, %124, %125 : vector<8x8xi1>, vector<8x8xf32>
      %c0_70 = arith.constant 0 : index
      %c3 = arith.constant 3 : index
      %127 = vector.load %arg7[%c0_70, %c3] : memref<8x4xf32, #tpu.memory_space<vmem>>, vector<8x1xf32>
      %cst_71 = arith.constant dense<0xFF800000> : vector<8xf32>
      %128 = vector.multi_reduction <maximumf>, %126, %cst_71 [1] : vector<8x8xf32> to vector<8xf32>
      %129 = vector.shape_cast %128 : vector<8xf32> to vector<8x1xf32>
      %130 = arith.maximumf %127, %129 : vector<8x1xf32>
      %131 = arith.subf %127, %130 : vector<8x1xf32>
      %132 = math.exp %131 : vector<8x1xf32>
      %133 = vector.broadcast %130 : vector<8x1xf32> to vector<8x8xf32>
      %134 = arith.subf %126, %133 : vector<8x8xf32>
      %135 = math.exp %134 : vector<8x8xf32>
      %c0_72 = arith.constant 0 : index
      %c3_73 = arith.constant 3 : index
      %136 = vector.load %arg8[%c0_72, %c3_73] : memref<8x4xf32, #tpu.memory_space<vmem>>, vector<8x1xf32>
      %137 = arith.mulf %132, %136 : vector<8x1xf32>
      %cst_74 = arith.constant dense<0.000000e+00> : vector<8xf32>
      %138 = vector.multi_reduction <add>, %135, %cst_74 [1] : vector<8x8xf32> to vector<8xf32>
      %139 = vector.shape_cast %138 : vector<8xf32> to vector<8x1xf32>
      %140 = arith.addf %137, %139 : vector<8x1xf32>
      %c0_75 = arith.constant 0 : index
      %c3_76 = arith.constant 3 : index
      %141 = vector.load %arg8[%c0_75, %c3_76] : memref<8x4xf32, #tpu.memory_space<vmem>>, vector<8x1xf32>
      tpu.vector_store %arg8[%c0_75, %c3_76], %140 {strides = array<i32>} : memref<8x4xf32, #tpu.memory_space<vmem>>, vector<8x1xf32>,
      %c0_77 = arith.constant 0 : index
      %c24 = arith.constant 24 : index
      %142 = vector.load %arg9[%c0_77, %c24] : memref<8x32xf32, #tpu.memory_space<vmem>>, vector<8x8xf32>
      %143 = vector.broadcast %132 : vector<8x1xf32> to vector<8x8xf32>
      %144 = arith.mulf %143, %142 : vector<8x8xf32>
      %145 = arith.truncf %135 : vector<8x8xf32> to vector<8x8xbf16>
      %146 = vector.extract_strided_slice %17 {offsets = [0, 24], sizes = [8, 8], strides = [1, 1]} : vector<8x32xbf16> to vector<8x8xbf16>
      %cst_78 = arith.constant dense<0.000000e+00> : vector<8x8xf32>
      %147 = tpu.matmul %145, %146, %cst_78 {dimension_numbers = #tpu.dot_dimension_numbers<[1], [0], [0], [1], [0, 0, 1, 1], [], []>} : vector<8x8xbf16>, vector<8x8xbf16>, vector<8x8xf32> -> vector<8x8xf32>
      %148 = arith.addf %144, %147 : vector<8x8xf32>
      %c0_79 = arith.constant 0 : index
      %c24_80 = arith.constant 24 : index
      %149 = vector.load %arg9[%c0_79, %c24_80] : memref<8x32xf32, #tpu.memory_space<vmem>>, vector<8x8xf32>
      tpu.vector_store %arg9[%c0_79, %c24_80], %148 {strides = array<i32>} : memref<8x32xf32, #tpu.memory_space<vmem>>, vector<8x8xf32>,
      %c0_81 = arith.constant 0 : index
      %c3_82 = arith.constant 3 : index
      %150 = vector.load %arg7[%c0_81, %c3_82] : memref<8x4xf32, #tpu.memory_space<vmem>>, vector<8x1xf32>
      tpu.vector_store %arg7[%c0_81, %c3_82], %130 {strides = array<i32>} : memref<8x4xf32, #tpu.memory_space<vmem>>, vector<8x1xf32>,
    } else {
    }
    %c0_i32_3 = arith.constant 0 : i32
    %9 = arith.cmpi eq, %arg2, %c0_i32_3 : i32
    %10 = arith.extui %9 : i1 to i32
    %c0_i32_4 = arith.constant 0 : i32
    %11 = arith.cmpi ne, %10, %c0_i32_4 : i32
    scf.if %11 {
      %c0 = arith.constant 0 : index
      %c0_5 = arith.constant 0 : index
      %12 = vector.load %arg8[%c0, %c0_5] : memref<8x4xf32, #tpu.memory_space<vmem>>, vector<8x1xf32>
      %13 = tpu.reciprocal %12 {approx = true} : vector<8x1xf32> -> vector<8x1xf32>
      %c0_6 = arith.constant 0 : index
      %c0_7 = arith.constant 0 : index
      %14 = vector.load %arg9[%c0_6, %c0_7] : memref<8x32xf32, #tpu.memory_space<vmem>>, vector<8x8xf32>
      %15 = vector.broadcast %13 : vector<8x1xf32> to vector<8x8xf32>
      %16 = arith.mulf %14, %15 : vector<8x8xf32>
      %17 = arith.truncf %16 : vector<8x8xf32> to vector<8x8xbf16>
      %c0_8 = arith.constant 0 : index
      %c0_9 = arith.constant 0 : index
      %c0_10 = arith.constant 0 : index
      %18 = vector.load %arg6[%c0_8, %c0_9, %c0_10] : memref<1x8x32xbf16, #tpu.memory_space<vmem>>, vector<1x8x8xbf16>
      %19 = vector.shape_cast %18 : vector<1x8x8xbf16> to vector<8x8xbf16>
      %20 = vector.shape_cast %17 : vector<8x8xbf16> to vector<1x8x8xbf16>
      tpu.vector_store %arg6[%c0_8, %c0_9, %c0_10], %20 {strides = array<i32>} : memref<1x8x32xbf16, #tpu.memory_space<vmem>>, vector<1x8x8xbf16>,
      %c0_11 = arith.constant 0 : index
      %c1 = arith.constant 1 : index
      %21 = vector.load %arg8[%c0_11, %c1] : memref<8x4xf32, #tpu.memory_space<vmem>>, vector<8x1xf32>
      %22 = tpu.reciprocal %21 {approx = true} : vector<8x1xf32> -> vector<8x1xf32>
      %c0_12 = arith.constant 0 : index
      %c8 = arith.constant 8 : index
      %23 = vector.load %arg9[%c0_12, %c8] : memref<8x32xf32, #tpu.memory_space<vmem>>, vector<8x8xf32>
      %24 = vector.broadcast %22 : vector<8x1xf32> to vector<8x8xf32>
      %25 = arith.mulf %23, %24 : vector<8x8xf32>
      %26 = arith.truncf %25 : vector<8x8xf32> to vector<8x8xbf16>
      %c0_13 = arith.constant 0 : index
      %c0_14 = arith.constant 0 : index
      %c8_15 = arith.constant 8 : index
      %27 = vector.load %arg6[%c0_13, %c0_14, %c8_15] : memref<1x8x32xbf16, #tpu.memory_space<vmem>>, vector<1x8x8xbf16>
      %28 = vector.shape_cast %27 : vector<1x8x8xbf16> to vector<8x8xbf16>
      %29 = vector.shape_cast %26 : vector<8x8xbf16> to vector<1x8x8xbf16>
      tpu.vector_store %arg6[%c0_13, %c0_14, %c8_15], %29 {strides = array<i32>} : memref<1x8x32xbf16, #tpu.memory_space<vmem>>, vector<1x8x8xbf16>,
      %c0_16 = arith.constant 0 : index
      %c2 = arith.constant 2 : index
      %30 = vector.load %arg8[%c0_16, %c2] : memref<8x4xf32, #tpu.memory_space<vmem>>, vector<8x1xf32>
      %31 = tpu.reciprocal %30 {approx = true} : vector<8x1xf32> -> vector<8x1xf32>
      %c0_17 = arith.constant 0 : index
      %c16 = arith.constant 16 : index
      %32 = vector.load %arg9[%c0_17, %c16] : memref<8x32xf32, #tpu.memory_space<vmem>>, vector<8x8xf32>
      %33 = vector.broadcast %31 : vector<8x1xf32> to vector<8x8xf32>
      %34 = arith.mulf %32, %33 : vector<8x8xf32>
      %35 = arith.truncf %34 : vector<8x8xf32> to vector<8x8xbf16>
      %c0_18 = arith.constant 0 : index
      %c0_19 = arith.constant 0 : index
      %c16_20 = arith.constant 16 : index
      %36 = vector.load %arg6[%c0_18, %c0_19, %c16_20] : memref<1x8x32xbf16, #tpu.memory_space<vmem>>, vector<1x8x8xbf16>
      %37 = vector.shape_cast %36 : vector<1x8x8xbf16> to vector<8x8xbf16>
      %38 = vector.shape_cast %35 : vector<8x8xbf16> to vector<1x8x8xbf16>
      tpu.vector_store %arg6[%c0_18, %c0_19, %c16_20], %38 {strides = array<i32>} : memref<1x8x32xbf16, #tpu.memory_space<vmem>>, vector<1x8x8xbf16>,
      %c0_21 = arith.constant 0 : index
      %c3 = arith.constant 3 : index
      %39 = vector.load %arg8[%c0_21, %c3] : memref<8x4xf32, #tpu.memory_space<vmem>>, vector<8x1xf32>
      %40 = tpu.reciprocal %39 {approx = true} : vector<8x1xf32> -> vector<8x1xf32>
      %c0_22 = arith.constant 0 : index
      %c24 = arith.constant 24 : index
      %41 = vector.load %arg9[%c0_22, %c24] : memref<8x32xf32, #tpu.memory_space<vmem>>, vector<8x8xf32>
      %42 = vector.broadcast %40 : vector<8x1xf32> to vector<8x8xf32>
      %43 = arith.mulf %41, %42 : vector<8x8xf32>
      %44 = arith.truncf %43 : vector<8x8xf32> to vector<8x8xbf16>
      %c0_23 = arith.constant 0 : index
      %c0_24 = arith.constant 0 : index
      %c24_25 = arith.constant 24 : index
      %45 = vector.load %arg6[%c0_23, %c0_24, %c24_25] : memref<1x8x32xbf16, #tpu.memory_space<vmem>>, vector<1x8x8xbf16>
      %46 = vector.shape_cast %45 : vector<1x8x8xbf16> to vector<8x8xbf16>
      %47 = vector.shape_cast %44 : vector<8x8xbf16> to vector<1x8x8xbf16>
      tpu.vector_store %arg6[%c0_23, %c0_24, %c24_25], %47 {strides = array<i32>} : memref<1x8x32xbf16, #tpu.memory_space<vmem>>, vector<1x8x8xbf16>,
    } else {
    }
    return
  }
  func.func @transform_0(%arg0: i32, %arg1: i32, %arg2: i32) -> (i32, i32, i32, i32) {
    %c0_i32 = arith.constant 0 : i32
    %c0_i32_0 = arith.constant 0 : i32
    %c0_i32_1 = arith.constant 0 : i32
    return %c0_i32, %arg0, %arg1, %c0_i32_0 : i32, i32, i32, i32
  }
  func.func @transform_1(%arg0: i32, %arg1: i32, %arg2: i32) -> (i32, i32, i32, i32) {
    %c1_i32 = arith.constant 1 : i32
    %c0_i32 = arith.constant 0 : i32
    %c0_i32_0 = arith.constant 0 : i32
    return %c1_i32, %arg0, %arg2, %c0_i32 : i32, i32, i32, i32
  }
  func.func @transform_2(%arg0: i32, %arg1: i32, %arg2: i32) -> (i32, i32, i32, i32) {
    %c2_i32 = arith.constant 2 : i32
    %c0_i32 = arith.constant 0 : i32
    %c0_i32_0 = arith.constant 0 : i32
    return %c2_i32, %arg0, %arg2, %c0_i32 : i32, i32, i32, i32
  }
  func.func @transform_3(%arg0: i32, %arg1: i32, %arg2: i32) -> (i32, i32, i32) {
    %c0_i32 = arith.constant 0 : i32
    %c0_i32_0 = arith.constant 0 : i32
    return %arg0, %arg1, %c0_i32 : i32, i32, i32
  }
}

module attributes {stable_mosaic.version = 11 : i64} {
  func.func @_ln_qkv_kernel(%arg0: i32, %arg1: i32, %arg2: i32, %arg3: memref<1x8x32xbf16, #tpu.memory_space<vmem>>, %arg4: memref<1x32xf32, #tpu.memory_space<vmem>>, %arg5: memref<1x32xf32, #tpu.memory_space<vmem>>, %arg6: memref<1x32x32xbf16, #tpu.memory_space<vmem>>, %arg7: memref<1x1x32xf32, #tpu.memory_space<vmem>>, %arg8: memref<1x1x8x32xbf16, #tpu.memory_space<vmem>>) attributes {dimension_semantics = [#tpu.dimension_semantics<parallel>, #tpu.dimension_semantics<parallel>, #tpu.dimension_semantics<parallel>], iteration_bounds = array<i64: 2, 1, 3>, scalar_prefetch = 0 : i64, scratch_operands = 0 : i64, tpu.core_type = #tpu.core_type<tc>, window_params = [{transform_indices = @transform_0, window_bounds = array<i64: 1, 8, 32>}, {pipeline_mode = #tpu.pipeline_mode<synchronous>, transform_indices = @transform_1, window_bounds = array<i64: 1, 32>}, {pipeline_mode = #tpu.pipeline_mode<synchronous>, transform_indices = @transform_2, window_bounds = array<i64: 1, 32>}, {transform_indices = @transform_3, window_bounds = array<i64: 1, 32, 32>}, {transform_indices = @transform_4, window_bounds = array<i64: 1, 1, 32>}, {transform_indices = @transform_5, window_bounds = array<i64: 1, 1, 8, 32>}]} {
    %c0 = arith.constant 0 : index
    %c0_0 = arith.constant 0 : index
    %c0_1 = arith.constant 0 : index
    %0 = vector.load %arg3[%c0, %c0_0, %c0_1] : memref<1x8x32xbf16, #tpu.memory_space<vmem>>, vector<1x8x32xbf16>
    %1 = vector.shape_cast %0 : vector<1x8x32xbf16> to vector<8x32xbf16>
    %2 = arith.extf %1 : vector<8x32xbf16> to vector<8x32xf32>
    %cst = arith.constant dense<0.000000e+00> : vector<8xf32>
    %3 = vector.multi_reduction <add>, %2, %cst [1] : vector<8x32xf32> to vector<8xf32>
    %4 = vector.shape_cast %3 : vector<8xf32> to vector<8x1xf32>
    %cst_2 = arith.constant 3.200000e+01 : f32
    %5 = vector.broadcast %cst_2 : f32 to vector<8x1xf32>
    %6 = arith.divf %4, %5 : vector<8x1xf32>
    %7 = vector.broadcast %6 : vector<8x1xf32> to vector<8x32xf32>
    %8 = arith.subf %2, %7 : vector<8x32xf32>
    %9 = arith.mulf %8, %8 : vector<8x32xf32>
    %cst_3 = arith.constant dense<0.000000e+00> : vector<8xf32>
    %10 = vector.multi_reduction <add>, %9, %cst_3 [1] : vector<8x32xf32> to vector<8xf32>
    %11 = vector.shape_cast %10 : vector<8xf32> to vector<8x1xf32>
    %cst_4 = arith.constant 3.200000e+01 : f32
    %12 = vector.broadcast %cst_4 : f32 to vector<8x1xf32>
    %13 = arith.divf %11, %12 : vector<8x1xf32>
    %14 = vector.broadcast %6 : vector<8x1xf32> to vector<8x32xf32>
    %15 = arith.subf %2, %14 : vector<8x32xf32>
    %cst_5 = arith.constant 9.99999974E-6 : f32
    %16 = vector.broadcast %cst_5 : f32 to vector<8x1xf32>
    %17 = arith.addf %13, %16 : vector<8x1xf32>
    %18 = math.rsqrt %17 : vector<8x1xf32>
    %19 = vector.broadcast %18 : vector<8x1xf32> to vector<8x32xf32>
    %20 = arith.mulf %15, %19 : vector<8x32xf32>
    %c0_6 = arith.constant 0 : index
    %c0_7 = arith.constant 0 : index
    %21 = vector.load %arg4[%c0_6, %c0_7] : memref<1x32xf32, #tpu.memory_space<vmem>>, vector<1x32xf32>
    %22 = vector.broadcast %21 : vector<1x32xf32> to vector<8x32xf32>
    %23 = arith.mulf %20, %22 : vector<8x32xf32>
    %c0_8 = arith.constant 0 : index
    %c0_9 = arith.constant 0 : index
    %24 = vector.load %arg5[%c0_8, %c0_9] : memref<1x32xf32, #tpu.memory_space<vmem>>, vector<1x32xf32>
    %25 = vector.broadcast %24 : vector<1x32xf32> to vector<8x32xf32>
    %26 = arith.addf %23, %25 : vector<8x32xf32>
    %27 = arith.truncf %26 : vector<8x32xf32> to vector<8x32xbf16>
    %c0_10 = arith.constant 0 : index
    %c0_11 = arith.constant 0 : index
    %c0_12 = arith.constant 0 : index
    %28 = vector.load %arg6[%c0_10, %c0_11, %c0_12] : memref<1x32x32xbf16, #tpu.memory_space<vmem>>, vector<1x32x32xbf16>
    %29 = vector.shape_cast %28 : vector<1x32x32xbf16> to vector<32x32xbf16>
    %cst_13 = arith.constant dense<0.000000e+00> : vector<8x32xf32>
    %30 = tpu.matmul %27, %29, %cst_13 {dimension_numbers = #tpu.dot_dimension_numbers<[1], [0], [0], [1], [0, 0, 1, 1], [], []>} : vector<8x32xbf16>, vector<32x32xbf16>, vector<8x32xf32> -> vector<8x32xf32>
    %c0_14 = arith.constant 0 : index
    %c0_15 = arith.constant 0 : index
    %c0_16 = arith.constant 0 : index
    %31 = vector.load %arg7[%c0_14, %c0_15, %c0_16] : memref<1x1x32xf32, #tpu.memory_space<vmem>>, vector<1x1x32xf32>
    %32 = vector.shape_cast %31 : vector<1x1x32xf32> to vector<1x32xf32>
    %33 = vector.broadcast %32 : vector<1x32xf32> to vector<8x32xf32>
    %34 = arith.addf %30, %33 : vector<8x32xf32>
    %35 = arith.truncf %34 : vector<8x32xf32> to vector<8x32xbf16>
    %c0_17 = arith.constant 0 : index
    %c0_18 = arith.constant 0 : index
    %c0_19 = arith.constant 0 : index
    %c0_20 = arith.constant 0 : index
    %36 = vector.load %arg8[%c0_17, %c0_18, %c0_19, %c0_20] : memref<1x1x8x32xbf16, #tpu.memory_space<vmem>>, vector<1x1x8x32xbf16>
    %37 = vector.shape_cast %36 : vector<1x1x8x32xbf16> to vector<8x32xbf16>
    %38 = vector.shape_cast %35 : vector<8x32xbf16> to vector<1x1x8x32xbf16>
    tpu.vector_store %arg8[%c0_17, %c0_18, %c0_19, %c0_20], %38 {strides = array<i32>} : memref<1x1x8x32xbf16, #tpu.memory_space<vmem>>, vector<1x1x8x32xbf16>,
    return
  }
  func.func @transform_0(%arg0: i32, %arg1: i32, %arg2: i32) -> (i32, i32, i32) {
    %c0_i32 = arith.constant 0 : i32
    %c0_i32_0 = arith.constant 0 : i32
    return %arg0, %arg1, %c0_i32 : i32, i32, i32
  }
  func.func @transform_1(%arg0: i32, %arg1: i32, %arg2: i32) -> (i32, i32) {
    %c0_i32 = arith.constant 0 : i32
    %c0_i32_0 = arith.constant 0 : i32
    %c0_i32_1 = arith.constant 0 : i32
    return %c0_i32, %c0_i32_0 : i32, i32
  }
  func.func @transform_2(%arg0: i32, %arg1: i32, %arg2: i32) -> (i32, i32) {
    %c0_i32 = arith.constant 0 : i32
    %c0_i32_0 = arith.constant 0 : i32
    %c0_i32_1 = arith.constant 0 : i32
    return %c0_i32, %c0_i32_0 : i32, i32
  }
  func.func @transform_3(%arg0: i32, %arg1: i32, %arg2: i32) -> (i32, i32, i32) {
    %c0_i32 = arith.constant 0 : i32
    %c0_i32_0 = arith.constant 0 : i32
    %c0_i32_1 = arith.constant 0 : i32
    return %arg2, %c0_i32, %c0_i32_0 : i32, i32, i32
  }
  func.func @transform_4(%arg0: i32, %arg1: i32, %arg2: i32) -> (i32, i32, i32) {
    %c0_i32 = arith.constant 0 : i32
    %c0_i32_0 = arith.constant 0 : i32
    %c0_i32_1 = arith.constant 0 : i32
    return %arg2, %c0_i32, %c0_i32_0 : i32, i32, i32
  }
  func.func @transform_5(%arg0: i32, %arg1: i32, %arg2: i32) -> (i32, i32, i32, i32) {
    %c0_i32 = arith.constant 0 : i32
    %c0_i32_0 = arith.constant 0 : i32
    return %arg2, %arg0, %arg1, %c0_i32 : i32, i32, i32, i32
  }
}

module attributes {stable_mosaic.version = 11 : i64} {
  func.func @_matmul_res_kernel(%arg0: i32, %arg1: i32, %arg2: i32, %arg3: memref<16x32xbf16, #tpu.memory_space<vmem>>, %arg4: memref<32x32xbf16, #tpu.memory_space<vmem>>, %arg5: memref<1x32xf32, #tpu.memory_space<vmem>>, %arg6: memref<16x32xbf16, #tpu.memory_space<vmem>>, %arg7: memref<16x32xbf16, #tpu.memory_space<vmem>>, %arg8: memref<16x32xf32, #tpu.memory_space<vmem>>) attributes {dimension_semantics = [#tpu.dimension_semantics<parallel>, #tpu.dimension_semantics<parallel>, #tpu.dimension_semantics<arbitrary>], iteration_bounds = array<i64: 1, 1, 1>, scalar_prefetch = 0 : i64, scratch_operands = 1 : i64, tpu.core_type = #tpu.core_type<tc>, window_params = [{transform_indices = @transform_0, window_bounds = array<i64: 16, 32>}, {transform_indices = @transform_1, window_bounds = array<i64: 32, 32>}, {transform_indices = @transform_2, window_bounds = array<i64: 1, 32>}, {transform_indices = @transform_3, window_bounds = array<i64: 16, 32>}, {transform_indices = @transform_4, window_bounds = array<i64: 16, 32>}]} {
    %c0_i32 = arith.constant 0 : i32
    %0 = arith.cmpi eq, %arg2, %c0_i32 : i32
    %1 = arith.extui %0 : i1 to i32
    %c0_i32_0 = arith.constant 0 : i32
    %2 = arith.cmpi ne, %1, %c0_i32_0 : i32
    scf.if %2 {
      %cst_10 = arith.constant 0.000000e+00 : f32
      %12 = vector.broadcast %cst_10 : f32 to vector<16x32xf32>
      %c0_11 = arith.constant 0 : index
      %c0_12 = arith.constant 0 : index
      %13 = vector.load %arg8[%c0_11, %c0_12] : memref<16x32xf32, #tpu.memory_space<vmem>>, vector<16x32xf32>
      tpu.vector_store %arg8[%c0_11, %c0_12], %12 {strides = array<i32>} : memref<16x32xf32, #tpu.memory_space<vmem>>, vector<16x32xf32>,
    } else {
    }
    %c0 = arith.constant 0 : index
    %c0_1 = arith.constant 0 : index
    %3 = vector.load %arg8[%c0, %c0_1] : memref<16x32xf32, #tpu.memory_space<vmem>>, vector<16x32xf32>
    %c0_2 = arith.constant 0 : index
    %c0_3 = arith.constant 0 : index
    %4 = vector.load %arg3[%c0_2, %c0_3] : memref<16x32xbf16, #tpu.memory_space<vmem>>, vector<16x32xbf16>
    %c0_4 = arith.constant 0 : index
    %c0_5 = arith.constant 0 : index
    %5 = vector.load %arg4[%c0_4, %c0_5] : memref<32x32xbf16, #tpu.memory_space<vmem>>, vector<32x32xbf16>
    %cst = arith.constant dense<0.000000e+00> : vector<16x32xf32>
    %6 = tpu.matmul %4, %5, %cst {dimension_numbers = #tpu.dot_dimension_numbers<[1], [0], [0], [1], [0, 0, 1, 1], [], []>} : vector<16x32xbf16>, vector<32x32xbf16>, vector<16x32xf32> -> vector<16x32xf32>
    %7 = arith.addf %3, %6 : vector<16x32xf32>
    %c0_6 = arith.constant 0 : index
    %c0_7 = arith.constant 0 : index
    %8 = vector.load %arg8[%c0_6, %c0_7] : memref<16x32xf32, #tpu.memory_space<vmem>>, vector<16x32xf32>
    tpu.vector_store %arg8[%c0_6, %c0_7], %7 {strides = array<i32>} : memref<16x32xf32, #tpu.memory_space<vmem>>, vector<16x32xf32>,
    %c0_i32_8 = arith.constant 0 : i32
    %9 = arith.cmpi eq, %arg2, %c0_i32_8 : i32
    %10 = arith.extui %9 : i1 to i32
    %c0_i32_9 = arith.constant 0 : i32
    %11 = arith.cmpi ne, %10, %c0_i32_9 : i32
    scf.if %11 {
      %c0_10 = arith.constant 0 : index
      %c0_11 = arith.constant 0 : index
      %12 = vector.load %arg8[%c0_10, %c0_11] : memref<16x32xf32, #tpu.memory_space<vmem>>, vector<16x32xf32>
      %c0_12 = arith.constant 0 : index
      %c0_13 = arith.constant 0 : index
      %13 = vector.load %arg5[%c0_12, %c0_13] : memref<1x32xf32, #tpu.memory_space<vmem>>, vector<1x32xf32>
      %14 = vector.broadcast %13 : vector<1x32xf32> to vector<16x32xf32>
      %15 = arith.addf %12, %14 : vector<16x32xf32>
      %c0_14 = arith.constant 0 : index
      %c0_15 = arith.constant 0 : index
      %16 = vector.load %arg6[%c0_14, %c0_15] : memref<16x32xbf16, #tpu.memory_space<vmem>>, vector<16x32xbf16>
      %17 = arith.extf %16 : vector<16x32xbf16> to vector<16x32xf32>
      %18 = arith.addf %15, %17 : vector<16x32xf32>
      %19 = arith.truncf %18 : vector<16x32xf32> to vector<16x32xbf16>
      %c0_16 = arith.constant 0 : index
      %c0_17 = arith.constant 0 : index
      %20 = vector.load %arg7[%c0_16, %c0_17] : memref<16x32xbf16, #tpu.memory_space<vmem>>, vector<16x32xbf16>
      tpu.vector_store %arg7[%c0_16, %c0_17], %19 {strides = array<i32>} : memref<16x32xbf16, #tpu.memory_space<vmem>>, vector<16x32xbf16>,
    } else {
    }
    return
  }
  func.func @transform_0(%arg0: i32, %arg1: i32, %arg2: i32) -> (i32, i32) {
    %c0_i32 = arith.constant 0 : i32
    return %arg0, %arg2 : i32, i32
  }
  func.func @transform_1(%arg0: i32, %arg1: i32, %arg2: i32) -> (i32, i32) {
    %c0_i32 = arith.constant 0 : i32
    return %arg2, %arg1 : i32, i32
  }
  func.func @transform_2(%arg0: i32, %arg1: i32, %arg2: i32) -> (i32, i32) {
    %c0_i32 = arith.constant 0 : i32
    %c0_i32_0 = arith.constant 0 : i32
    return %c0_i32, %arg1 : i32, i32
  }
  func.func @transform_3(%arg0: i32, %arg1: i32, %arg2: i32) -> (i32, i32) {
    %c0_i32 = arith.constant 0 : i32
    return %arg0, %arg1 : i32, i32
  }
  func.func @transform_4(%arg0: i32, %arg1: i32, %arg2: i32) -> (i32, i32) {
    %c0_i32 = arith.constant 0 : i32
    return %arg0, %arg1 : i32, i32
  }
}

module attributes {stable_mosaic.version = 11 : i64} {
  func.func @_ln_matmul_kernel(%arg0: i32, %arg1: i32, %arg2: memref<16x32xbf16, #tpu.memory_space<vmem>>, %arg3: memref<1x32xf32, #tpu.memory_space<vmem>>, %arg4: memref<1x32xf32, #tpu.memory_space<vmem>>, %arg5: memref<32x64xbf16, #tpu.memory_space<vmem>>, %arg6: memref<1x64xf32, #tpu.memory_space<vmem>>, %arg7: memref<16x64xbf16, #tpu.memory_space<vmem>>) attributes {dimension_semantics = [#tpu.dimension_semantics<parallel>, #tpu.dimension_semantics<parallel>], iteration_bounds = array<i64: 1, 1>, scalar_prefetch = 0 : i64, scratch_operands = 0 : i64, tpu.core_type = #tpu.core_type<tc>, window_params = [{transform_indices = @transform_0, window_bounds = array<i64: 16, 32>}, {pipeline_mode = #tpu.pipeline_mode<synchronous>, transform_indices = @transform_1, window_bounds = array<i64: 1, 32>}, {pipeline_mode = #tpu.pipeline_mode<synchronous>, transform_indices = @transform_2, window_bounds = array<i64: 1, 32>}, {transform_indices = @transform_3, window_bounds = array<i64: 32, 64>}, {transform_indices = @transform_4, window_bounds = array<i64: 1, 64>}, {transform_indices = @transform_5, window_bounds = array<i64: 16, 64>}]} {
    %c0 = arith.constant 0 : index
    %c0_0 = arith.constant 0 : index
    %0 = vector.load %arg2[%c0, %c0_0] : memref<16x32xbf16, #tpu.memory_space<vmem>>, vector<16x32xbf16>
    %1 = arith.extf %0 : vector<16x32xbf16> to vector<16x32xf32>
    %cst = arith.constant dense<0.000000e+00> : vector<16xf32>
    %2 = vector.multi_reduction <add>, %1, %cst [1] : vector<16x32xf32> to vector<16xf32>
    %3 = vector.shape_cast %2 : vector<16xf32> to vector<16x1xf32>
    %cst_1 = arith.constant 3.200000e+01 : f32
    %4 = vector.broadcast %cst_1 : f32 to vector<16x1xf32>
    %5 = arith.divf %3, %4 : vector<16x1xf32>
    %6 = vector.broadcast %5 : vector<16x1xf32> to vector<16x32xf32>
    %7 = arith.subf %1, %6 : vector<16x32xf32>
    %8 = arith.mulf %7, %7 : vector<16x32xf32>
    %cst_2 = arith.constant dense<0.000000e+00> : vector<16xf32>
    %9 = vector.multi_reduction <add>, %8, %cst_2 [1] : vector<16x32xf32> to vector<16xf32>
    %10 = vector.shape_cast %9 : vector<16xf32> to vector<16x1xf32>
    %cst_3 = arith.constant 3.200000e+01 : f32
    %11 = vector.broadcast %cst_3 : f32 to vector<16x1xf32>
    %12 = arith.divf %10, %11 : vector<16x1xf32>
    %13 = vector.broadcast %5 : vector<16x1xf32> to vector<16x32xf32>
    %14 = arith.subf %1, %13 : vector<16x32xf32>
    %cst_4 = arith.constant 9.99999974E-6 : f32
    %15 = vector.broadcast %cst_4 : f32 to vector<16x1xf32>
    %16 = arith.addf %12, %15 : vector<16x1xf32>
    %17 = math.rsqrt %16 : vector<16x1xf32>
    %18 = vector.broadcast %17 : vector<16x1xf32> to vector<16x32xf32>
    %19 = arith.mulf %14, %18 : vector<16x32xf32>
    %c0_5 = arith.constant 0 : index
    %c0_6 = arith.constant 0 : index
    %20 = vector.load %arg3[%c0_5, %c0_6] : memref<1x32xf32, #tpu.memory_space<vmem>>, vector<1x32xf32>
    %21 = vector.broadcast %20 : vector<1x32xf32> to vector<16x32xf32>
    %22 = arith.mulf %19, %21 : vector<16x32xf32>
    %c0_7 = arith.constant 0 : index
    %c0_8 = arith.constant 0 : index
    %23 = vector.load %arg4[%c0_7, %c0_8] : memref<1x32xf32, #tpu.memory_space<vmem>>, vector<1x32xf32>
    %24 = vector.broadcast %23 : vector<1x32xf32> to vector<16x32xf32>
    %25 = arith.addf %22, %24 : vector<16x32xf32>
    %26 = arith.truncf %25 : vector<16x32xf32> to vector<16x32xbf16>
    %c0_9 = arith.constant 0 : index
    %c0_10 = arith.constant 0 : index
    %27 = vector.load %arg5[%c0_9, %c0_10] : memref<32x64xbf16, #tpu.memory_space<vmem>>, vector<32x64xbf16>
    %cst_11 = arith.constant dense<0.000000e+00> : vector<16x64xf32>
    %28 = tpu.matmul %26, %27, %cst_11 {dimension_numbers = #tpu.dot_dimension_numbers<[1], [0], [0], [1], [0, 0, 1, 1], [], []>} : vector<16x32xbf16>, vector<32x64xbf16>, vector<16x64xf32> -> vector<16x64xf32>
    %c0_12 = arith.constant 0 : index
    %c0_13 = arith.constant 0 : index
    %29 = vector.load %arg6[%c0_12, %c0_13] : memref<1x64xf32, #tpu.memory_space<vmem>>, vector<1x64xf32>
    %30 = vector.broadcast %29 : vector<1x64xf32> to vector<16x64xf32>
    %31 = arith.addf %28, %30 : vector<16x64xf32>
    %32 = arith.mulf %31, %31 : vector<16x64xf32>
    %33 = arith.mulf %31, %32 : vector<16x64xf32>
    %cst_14 = arith.constant 4.471500e-02 : f32
    %34 = vector.broadcast %cst_14 : f32 to vector<16x64xf32>
    %35 = arith.mulf %34, %33 : vector<16x64xf32>
    %36 = arith.addf %31, %35 : vector<16x64xf32>
    %cst_15 = arith.constant 0.797884583 : f32
    %37 = vector.broadcast %cst_15 : f32 to vector<16x64xf32>
    %38 = arith.mulf %37, %36 : vector<16x64xf32>
    %39 = math.tanh %38 : vector<16x64xf32>
    %cst_16 = arith.constant 1.000000e+00 : f32
    %40 = vector.broadcast %cst_16 : f32 to vector<16x64xf32>
    %41 = arith.addf %40, %39 : vector<16x64xf32>
    %cst_17 = arith.constant 5.000000e-01 : f32
    %42 = vector.broadcast %cst_17 : f32 to vector<16x64xf32>
    %43 = arith.mulf %42, %41 : vector<16x64xf32>
    %44 = arith.mulf %31, %43 : vector<16x64xf32>
    %45 = arith.truncf %44 : vector<16x64xf32> to vector<16x64xbf16>
    %c0_18 = arith.constant 0 : index
    %c0_19 = arith.constant 0 : index
    %46 = vector.load %arg7[%c0_18, %c0_19] : memref<16x64xbf16, #tpu.memory_space<vmem>>, vector<16x64xbf16>
    tpu.vector_store %arg7[%c0_18, %c0_19], %45 {strides = array<i32>} : memref<16x64xbf16, #tpu.memory_space<vmem>>, vector<16x64xbf16>,
    return
  }
  func.func @transform_0(%arg0: i32, %arg1: i32) -> (i32, i32) {
    %c0_i32 = arith.constant 0 : i32
    %c0_i32_0 = arith.constant 0 : i32
    return %arg0, %c0_i32 : i32, i32
  }
  func.func @transform_1(%arg0: i32, %arg1: i32) -> (i32, i32) {
    %c0_i32 = arith.constant 0 : i32
    %c0_i32_0 = arith.constant 0 : i32
    %c0_i32_1 = arith.constant 0 : i32
    return %c0_i32, %c0_i32_0 : i32, i32
  }
  func.func @transform_2(%arg0: i32, %arg1: i32) -> (i32, i32) {
    %c0_i32 = arith.constant 0 : i32
    %c0_i32_0 = arith.constant 0 : i32
    %c0_i32_1 = arith.constant 0 : i32
    return %c0_i32, %c0_i32_0 : i32, i32
  }
  func.func @transform_3(%arg0: i32, %arg1: i32) -> (i32, i32) {
    %c0_i32 = arith.constant 0 : i32
    %c0_i32_0 = arith.constant 0 : i32
    return %c0_i32, %arg1 : i32, i32
  }
  func.func @transform_4(%arg0: i32, %arg1: i32) -> (i32, i32) {
    %c0_i32 = arith.constant 0 : i32
    %c0_i32_0 = arith.constant 0 : i32
    return %c0_i32, %arg1 : i32, i32
  }
  func.func @transform_5(%arg0: i32, %arg1: i32) -> (i32, i32) {
    %c0_i32 = arith.constant 0 : i32
    return %arg0, %arg1 : i32, i32
  }
}

module attributes {stable_mosaic.version = 11 : i64} {
  func.func @_matmul_res_kernel(%arg0: i32, %arg1: i32, %arg2: i32, %arg3: memref<16x64xbf16, #tpu.memory_space<vmem>>, %arg4: memref<64x32xbf16, #tpu.memory_space<vmem>>, %arg5: memref<1x32xf32, #tpu.memory_space<vmem>>, %arg6: memref<16x32xbf16, #tpu.memory_space<vmem>>, %arg7: memref<16x32xbf16, #tpu.memory_space<vmem>>, %arg8: memref<16x32xf32, #tpu.memory_space<vmem>>) attributes {dimension_semantics = [#tpu.dimension_semantics<parallel>, #tpu.dimension_semantics<parallel>, #tpu.dimension_semantics<arbitrary>], iteration_bounds = array<i64: 1, 1, 1>, scalar_prefetch = 0 : i64, scratch_operands = 1 : i64, tpu.core_type = #tpu.core_type<tc>, window_params = [{transform_indices = @transform_0, window_bounds = array<i64: 16, 64>}, {transform_indices = @transform_1, window_bounds = array<i64: 64, 32>}, {transform_indices = @transform_2, window_bounds = array<i64: 1, 32>}, {transform_indices = @transform_3, window_bounds = array<i64: 16, 32>}, {transform_indices = @transform_4, window_bounds = array<i64: 16, 32>}]} {
    %c0_i32 = arith.constant 0 : i32
    %0 = arith.cmpi eq, %arg2, %c0_i32 : i32
    %1 = arith.extui %0 : i1 to i32
    %c0_i32_0 = arith.constant 0 : i32
    %2 = arith.cmpi ne, %1, %c0_i32_0 : i32
    scf.if %2 {
      %cst_10 = arith.constant 0.000000e+00 : f32
      %12 = vector.broadcast %cst_10 : f32 to vector<16x32xf32>
      %c0_11 = arith.constant 0 : index
      %c0_12 = arith.constant 0 : index
      %13 = vector.load %arg8[%c0_11, %c0_12] : memref<16x32xf32, #tpu.memory_space<vmem>>, vector<16x32xf32>
      tpu.vector_store %arg8[%c0_11, %c0_12], %12 {strides = array<i32>} : memref<16x32xf32, #tpu.memory_space<vmem>>, vector<16x32xf32>,
    } else {
    }
    %c0 = arith.constant 0 : index
    %c0_1 = arith.constant 0 : index
    %3 = vector.load %arg8[%c0, %c0_1] : memref<16x32xf32, #tpu.memory_space<vmem>>, vector<16x32xf32>
    %c0_2 = arith.constant 0 : index
    %c0_3 = arith.constant 0 : index
    %4 = vector.load %arg3[%c0_2, %c0_3] : memref<16x64xbf16, #tpu.memory_space<vmem>>, vector<16x64xbf16>
    %c0_4 = arith.constant 0 : index
    %c0_5 = arith.constant 0 : index
    %5 = vector.load %arg4[%c0_4, %c0_5] : memref<64x32xbf16, #tpu.memory_space<vmem>>, vector<64x32xbf16>
    %cst = arith.constant dense<0.000000e+00> : vector<16x32xf32>
    %6 = tpu.matmul %4, %5, %cst {dimension_numbers = #tpu.dot_dimension_numbers<[1], [0], [0], [1], [0, 0, 1, 1], [], []>} : vector<16x64xbf16>, vector<64x32xbf16>, vector<16x32xf32> -> vector<16x32xf32>
    %7 = arith.addf %3, %6 : vector<16x32xf32>
    %c0_6 = arith.constant 0 : index
    %c0_7 = arith.constant 0 : index
    %8 = vector.load %arg8[%c0_6, %c0_7] : memref<16x32xf32, #tpu.memory_space<vmem>>, vector<16x32xf32>
    tpu.vector_store %arg8[%c0_6, %c0_7], %7 {strides = array<i32>} : memref<16x32xf32, #tpu.memory_space<vmem>>, vector<16x32xf32>,
    %c0_i32_8 = arith.constant 0 : i32
    %9 = arith.cmpi eq, %arg2, %c0_i32_8 : i32
    %10 = arith.extui %9 : i1 to i32
    %c0_i32_9 = arith.constant 0 : i32
    %11 = arith.cmpi ne, %10, %c0_i32_9 : i32
    scf.if %11 {
      %c0_10 = arith.constant 0 : index
      %c0_11 = arith.constant 0 : index
      %12 = vector.load %arg8[%c0_10, %c0_11] : memref<16x32xf32, #tpu.memory_space<vmem>>, vector<16x32xf32>
      %c0_12 = arith.constant 0 : index
      %c0_13 = arith.constant 0 : index
      %13 = vector.load %arg5[%c0_12, %c0_13] : memref<1x32xf32, #tpu.memory_space<vmem>>, vector<1x32xf32>
      %14 = vector.broadcast %13 : vector<1x32xf32> to vector<16x32xf32>
      %15 = arith.addf %12, %14 : vector<16x32xf32>
      %c0_14 = arith.constant 0 : index
      %c0_15 = arith.constant 0 : index
      %16 = vector.load %arg6[%c0_14, %c0_15] : memref<16x32xbf16, #tpu.memory_space<vmem>>, vector<16x32xbf16>
      %17 = arith.extf %16 : vector<16x32xbf16> to vector<16x32xf32>
      %18 = arith.addf %15, %17 : vector<16x32xf32>
      %19 = arith.truncf %18 : vector<16x32xf32> to vector<16x32xbf16>
      %c0_16 = arith.constant 0 : index
      %c0_17 = arith.constant 0 : index
      %20 = vector.load %arg7[%c0_16, %c0_17] : memref<16x32xbf16, #tpu.memory_space<vmem>>, vector<16x32xbf16>
      tpu.vector_store %arg7[%c0_16, %c0_17], %19 {strides = array<i32>} : memref<16x32xbf16, #tpu.memory_space<vmem>>, vector<16x32xbf16>,
    } else {
    }
    return
  }
  func.func @transform_0(%arg0: i32, %arg1: i32, %arg2: i32) -> (i32, i32) {
    %c0_i32 = arith.constant 0 : i32
    return %arg0, %arg2 : i32, i32
  }
  func.func @transform_1(%arg0: i32, %arg1: i32, %arg2: i32) -> (i32, i32) {
    %c0_i32 = arith.constant 0 : i32
    return %arg2, %arg1 : i32, i32
  }
  func.func @transform_2(%arg0: i32, %arg1: i32, %arg2: i32) -> (i32, i32) {
    %c0_i32 = arith.constant 0 : i32
    %c0_i32_0 = arith.constant 0 : i32
    return %c0_i32, %arg1 : i32, i32
  }
  func.func @transform_3(%arg0: i32, %arg1: i32, %arg2: i32) -> (i32, i32) {
    %c0_i32 = arith.constant 0 : i32
    return %arg0, %arg1 : i32, i32
  }
  func.func @transform_4(%arg0: i32, %arg1: i32, %arg2: i32) -> (i32, i32) {
    %c0_i32 = arith.constant 0 : i32
    return %arg0, %arg1 : i32, i32
  }
}

module attributes {stable_mosaic.version = 11 : i64} {
  func.func @_ln_lm_head_kernel(%arg0: i32, %arg1: i32, %arg2: memref<16x32xbf16, #tpu.memory_space<vmem>>, %arg3: memref<1x32xf32, #tpu.memory_space<vmem>>, %arg4: memref<1x32xf32, #tpu.memory_space<vmem>>, %arg5: memref<128x32xbf16, #tpu.memory_space<vmem>>, %arg6: memref<16x128xf32, #tpu.memory_space<vmem>>) attributes {dimension_semantics = [#tpu.dimension_semantics<parallel>, #tpu.dimension_semantics<parallel>], iteration_bounds = array<i64: 1, 1>, scalar_prefetch = 0 : i64, scratch_operands = 0 : i64, tpu.core_type = #tpu.core_type<tc>, window_params = [{transform_indices = @transform_0, window_bounds = array<i64: 16, 32>}, {pipeline_mode = #tpu.pipeline_mode<synchronous>, transform_indices = @transform_1, window_bounds = array<i64: 1, 32>}, {pipeline_mode = #tpu.pipeline_mode<synchronous>, transform_indices = @transform_2, window_bounds = array<i64: 1, 32>}, {transform_indices = @transform_3, window_bounds = array<i64: 128, 32>}, {transform_indices = @transform_4, window_bounds = array<i64: 16, 128>}]} {
    %c0 = arith.constant 0 : index
    %c0_0 = arith.constant 0 : index
    %0 = vector.load %arg2[%c0, %c0_0] : memref<16x32xbf16, #tpu.memory_space<vmem>>, vector<16x32xbf16>
    %1 = arith.extf %0 : vector<16x32xbf16> to vector<16x32xf32>
    %cst = arith.constant dense<0.000000e+00> : vector<16xf32>
    %2 = vector.multi_reduction <add>, %1, %cst [1] : vector<16x32xf32> to vector<16xf32>
    %3 = vector.shape_cast %2 : vector<16xf32> to vector<16x1xf32>
    %cst_1 = arith.constant 3.200000e+01 : f32
    %4 = vector.broadcast %cst_1 : f32 to vector<16x1xf32>
    %5 = arith.divf %3, %4 : vector<16x1xf32>
    %6 = vector.broadcast %5 : vector<16x1xf32> to vector<16x32xf32>
    %7 = arith.subf %1, %6 : vector<16x32xf32>
    %8 = arith.mulf %7, %7 : vector<16x32xf32>
    %cst_2 = arith.constant dense<0.000000e+00> : vector<16xf32>
    %9 = vector.multi_reduction <add>, %8, %cst_2 [1] : vector<16x32xf32> to vector<16xf32>
    %10 = vector.shape_cast %9 : vector<16xf32> to vector<16x1xf32>
    %cst_3 = arith.constant 3.200000e+01 : f32
    %11 = vector.broadcast %cst_3 : f32 to vector<16x1xf32>
    %12 = arith.divf %10, %11 : vector<16x1xf32>
    %13 = vector.broadcast %5 : vector<16x1xf32> to vector<16x32xf32>
    %14 = arith.subf %1, %13 : vector<16x32xf32>
    %cst_4 = arith.constant 9.99999974E-6 : f32
    %15 = vector.broadcast %cst_4 : f32 to vector<16x1xf32>
    %16 = arith.addf %12, %15 : vector<16x1xf32>
    %17 = math.rsqrt %16 : vector<16x1xf32>
    %18 = vector.broadcast %17 : vector<16x1xf32> to vector<16x32xf32>
    %19 = arith.mulf %14, %18 : vector<16x32xf32>
    %c0_5 = arith.constant 0 : index
    %c0_6 = arith.constant 0 : index
    %20 = vector.load %arg3[%c0_5, %c0_6] : memref<1x32xf32, #tpu.memory_space<vmem>>, vector<1x32xf32>
    %21 = vector.broadcast %20 : vector<1x32xf32> to vector<16x32xf32>
    %22 = arith.mulf %19, %21 : vector<16x32xf32>
    %c0_7 = arith.constant 0 : index
    %c0_8 = arith.constant 0 : index
    %23 = vector.load %arg4[%c0_7, %c0_8] : memref<1x32xf32, #tpu.memory_space<vmem>>, vector<1x32xf32>
    %24 = vector.broadcast %23 : vector<1x32xf32> to vector<16x32xf32>
    %25 = arith.addf %22, %24 : vector<16x32xf32>
    %26 = arith.truncf %25 : vector<16x32xf32> to vector<16x32xbf16>
    %c0_9 = arith.constant 0 : index
    %c0_10 = arith.constant 0 : index
    %27 = vector.load %arg5[%c0_9, %c0_10] : memref<128x32xbf16, #tpu.memory_space<vmem>>, vector<128x32xbf16>
    %cst_11 = arith.constant dense<0.000000e+00> : vector<16x128xf32>
    %28 = tpu.matmul %26, %27, %cst_11 {dimension_numbers = #tpu.dot_dimension_numbers<[1], [1], [0], [0], [0, 0, 1, 0], [], []>} : vector<16x32xbf16>, vector<128x32xbf16>, vector<16x128xf32> -> vector<16x128xf32>
    %c0_12 = arith.constant 0 : index
    %c0_13 = arith.constant 0 : index
    %29 = vector.load %arg6[%c0_12, %c0_13] : memref<16x128xf32, #tpu.memory_space<vmem>>, vector<16x128xf32>
    tpu.vector_store %arg6[%c0_12, %c0_13], %28 {strides = array<i32>} : memref<16x128xf32, #tpu.memory_space<vmem>>, vector<16x128xf32>,
    return
  }
  func.func @transform_0(%arg0: i32, %arg1: i32) -> (i32, i32) {
    %c0_i32 = arith.constant 0 : i32
    %c0_i32_0 = arith.constant 0 : i32
    return %arg0, %c0_i32 : i32, i32
  }
  func.func @transform_1(%arg0: i32, %arg1: i32) -> (i32, i32) {
    %c0_i32 = arith.constant 0 : i32
    %c0_i32_0 = arith.constant 0 : i32
    %c0_i32_1 = arith.constant 0 : i32
    return %c0_i32, %c0_i32_0 : i32, i32
  }
  func.func @transform_2(%arg0: i32, %arg1: i32) -> (i32, i32) {
    %c0_i32 = arith.constant 0 : i32
    %c0_i32_0 = arith.constant 0 : i32
    %c0_i32_1 = arith.constant 0 : i32
    return %c0_i32, %c0_i32_0 : i32, i32
  }
  func.func @transform_3(%arg0: i32, %arg1: i32) -> (i32, i32) {
    %c0_i32 = arith.constant 0 : i32
    %c0_i32_0 = arith.constant 0 : i32
    return %arg1, %c0_i32 : i32, i32
  }
  func.func @transform_4(%arg0: i32, %arg1: i32) -> (i32, i32) {
    %c0_i32 = arith.constant 0 : i32
    return %arg0, %arg1 : i32, i32
  }
}

</mosaic_0001>

<bundles_post_ra>
// kernel: gpt_forward.14
= control target key start
LH: loop header
LB: loop body
LE: loop exit
PB: predicated region body
PF: predicated region fallthrough
CT: control target
= control target key end

     0   :  { %vm25_vm0 = vcmask 261120   ;;  %v209_v16 = vmov 0.0   ;;  %vm210_vm1 = vmmov 0   ;;  %vm165_vm2 = vcmask 519168   ;;  %s270_s0 = inlined_call_operand.vmem [shape: bf16[16,32], index: 0, kind: input, shape index: {}]   ;;  %s271_s3 = inlined_call_operand.vmem [shape: bf16[32,64], index: 3, kind: input, shape index: {}]   ;;  %s272_s1 = inlined_call_operand.vmem [shape: f32[1,32], index: 1, kind: input, shape index: {}]   ;;  %s273_s2 = inlined_call_operand.vmem [shape: f32[1,32], index: 2, kind: input, shape index: {}]   ;;  %s274_s4 = inlined_call_operand.vmem [shape: f32[1,64], index: 4, kind: input, shape index: {}]   ;;  %s275_s5 = inlined_call_operand.vmem [shape: bf16[16,64], index: 5, kind: output, shape index: {}]  }
   0x1   :  { %v183_v0 = vld [vmem:[%s270_s0] sm:$0xff]   ;;  %189 = vmatprep.subr.bf16.mxu0 %v209_v16  ;;  %v200_v17 = vld [vmem:[%s271_s3 + $0x8] sm:$0xff]   ;;  %193 = vmatprep.mubr.msk.bf16.mxu0 %vm210_vm1, %v209_v16 }
   0x2   :  { %v184_v1 = vunpack.c.l.bf16 %v183_v0  ;;  %v185_v2 = vunpack.c.h.bf16 %v183_v0  ;;  %v199_v15 = vld [vmem:[%s271_s3] sm:$0xff]  }
   0x3   :  { %190 = vmatpush3.bf16.msra.mxu0 %v199_v15  ;;  %v172_v26 = vld [vmem:[%s272_s1] ss:$0 sm:$0xff] }
   0x4   :  { %v26_v3 = vsel %vm25_vm0, %v184_v1, 0.0  ;;  %v29_v4 = vsel %vm25_vm0, %v185_v2, 0.0  ;;  %191 = vmatprep.subr.bf16.mxu0 %v209_v16  ;;  %v173_v30 = vld [vmem:[%s273_s2] ss:$0 sm:$0xff] }
   0x5   :  { %27 = vadd.xlane.f32.xlu0 %v26_v3  ;;  %v174_v35 = vld [vmem:[%s274_s4] ss:$0 sm:$0xff] }
   0x7   :  { %192 = vmatpush3.bf16.msra.mxu0 %v200_v17 }
   0x9   :  { %30 = vadd.xlane.f32.xlu0 %v29_v4 }
  0x92   :  { %v28_v5 = vpop.xlane.xlu0 %27 }
  0x93   :  { %v33_v6 = vmul.f32 0.03125, %v28_v5 }
  0x95   :  { %v35_v7 = vsub.f32 %v184_v1, %v33_v6 }
  0x96   :  { %v31_v8 = vpop.xlane.xlu0 %30 }
  0x97   :  { %v34_v9 = vmul.f32 0.03125, %v31_v8  ;;  %v37_v10 = vmul.f32 %v35_v7, %v35_v7 }
  0x99   :  { %v36_v11 = vsub.f32 %v185_v2, %v34_v9  ;;  %v39_v12 = vsel %vm25_vm0, %v37_v10, 0.0 }
  0x9a   :  { %40 = vadd.xlane.f32.xlu1 %v39_v12 }
  0x9b   :  { %v38_v13 = vmul.f32 %v36_v11, %v36_v11 }
  0x9d   :  { %v42_v14 = vsel %vm25_vm0, %v38_v13, 0.0 }
  0x9e   :  { %43 = vadd.xlane.f32.xlu1 %v42_v14 }
 0x127   :  { %v41_v18 = vpop.xlane.xlu1 %40 }
 0x128   :  { %v45_v19 = vmul.f32 0.03125, %v41_v18 }
 0x12a   :  { %v47_v20 = vadd.f32 1e-05, %v45_v19 }
 0x12b   :  { %v44_v21 = vpop.xlane.xlu1 %43 }
 0x12c   :  { %201 = vrsqrt.f32 %v47_v20  ;;  %v46_v22 = vmul.f32 0.03125, %v44_v21 }
 0x12e   :  { %v48_v23 = vadd.f32 1e-05, %v46_v22 }
 0x130   :  { %203 = vrsqrt.f32 %v48_v23 }
 0x136   :  { %v202_v24 = vpop.eup %201 }
 0x137   :  { %v51_v25 = vmul.f32 %v202_v24, %v35_v7 }
 0x139   :  { %v60_v29 = vmul.f32 %v172_v26, %v51_v25 }
 0x13a   :  { %v204_v27 = vpop.eup %203 }
 0x13b   :  { %v52_v28 = vmul.f32 %v204_v27, %v36_v11  ;;  %v69_v32 = vadd.f32 %v173_v30, %v60_v29 }
 0x13d   :  { %v61_v31 = vmul.f32 %v172_v26, %v52_v28 }
 0x13f   :  { %v70_v33 = vadd.f32 %v173_v30, %v61_v31 }
 0x141   :  { %v71_v34 = vpack.c.bf16 %v70_v33, %v69_v32 }
 0x143   :  { %194 = vmatmul.mubr.msk.bf16.vlgmr.msra.gmra.mrb[0].mxu0 %vm25_vm0, %v71_v34 }
 0x216   :  { %v132_v36 = vpop.f32.mrb[0].mxu0 }
 0x217   :  { %v133_v37 = vadd.f32 %v174_v35, %v132_v36  ;;  %v195_v38 = vpop.f32.mrb[1].mxu0 }
 0x218   :  { %v135_v39 = vpop.f32.mrb[2].mxu0 }
 0x219   :  { %v139_v40 = vmul.f32 %v133_v37, %v133_v37  ;;  %v136_v41 = vadd.f32 %v174_v35, %v135_v39  ;;  %v196_v42 = vpop.f32.mrb[3].mxu0 }
 0x21b   :  { %v141_v43 = vmul.f32 %v139_v40, %v133_v37  ;;  %v140_v44 = vmul.f32 %v136_v41, %v136_v41 }
 0x21d   :  { %v143_v45 = vmul.f32 0.044715, %v141_v43  ;;  %v142_v46 = vmul.f32 %v140_v44, %v136_v41 }
 0x21f   :  { %v145_v47 = vadd.f32 %v143_v45, %v133_v37  ;;  %v144_v48 = vmul.f32 0.044715, %v142_v46 }
 0x221   :  { %v147_v49 = vmul.f32 0.7978846, %v145_v47  ;;  %v146_v50 = vadd.f32 %v144_v48, %v136_v41 }
 0x223   :  { %205 = vtanh.f32 %v147_v49  ;;  %v148_v51 = vmul.f32 0.7978846, %v146_v50 }
 0x225   :  { %207 = vtanh.f32 %v148_v51 }
 0x22d   :  { %v206_v52 = vpop.eup %205 }
 0x22e   :  { %v151_v53 = vadd.f32 1.0, %v206_v52 }
 0x22f   :  { %v208_v54 = vpop.eup %207 }
 0x230   :  { %v153_v55 = vmul.f32 0.5, %v151_v53  ;;  %v152_v56 = vadd.f32 1.0, %v208_v54 }
 0x232   :  { %v155_v57 = vmul.f32 %v153_v55, %v133_v37  ;;  %v154_v58 = vmul.f32 0.5, %v152_v56 }
 0x234   :  { %v180_v59 = vpack.c.bf16 %v155_v57, %v155_v57  ;;  %v156_v60 = vmul.f32 %v154_v58, %v136_v41 }
 0x236   :  { %166 = vst.msk [vmem:[%s275_s5] sm:$0xf] %vm165_vm2, %v180_v59  ;;  %v181_v61 = vpack.c.bf16 %v156_v60, %v156_v60 }
 0x238   :  { %167 = vst.msk [vmem:[%s275_s5 + $0x4] sm:$0xf] %vm165_vm2, %v181_v61 }

// kernel: gpt_forward.11
= control target key start
LH: loop header
LB: loop body
LE: loop exit
PB: predicated region body
PF: predicated region fallthrough
CT: control target
= control target key end

     0   :  { %s671_s18 = smov 0   ;;  %s673_s19 = smov 0   ;;  %s745_s0 = inlined_call_operand.vmem [shape: bf16[2,8,32], index: 0, kind: input, shape index: {}]   ;;  %s746_s1 = inlined_call_operand.vmem [shape: f32[1,32], index: 1, kind: input, shape index: {}]   ;;  %s747_s2 = inlined_call_operand.vmem [shape: f32[1,32], index: 2, kind: input, shape index: {}]   ;;  %s748_s3 = inlined_call_operand.vmem [shape: bf16[3,32,32], index: 3, kind: input, shape index: {}]   ;;  %s749_s4 = inlined_call_operand.vmem [shape: f32[3,1,32], index: 4, kind: input, shape index: {}]   ;;  %s750_s5 = inlined_call_operand.vmem [shape: bf16[3,2,8,32], index: 5, kind: output, shape index: {}]  }
   0x1   :  { %s675_s20 = smov 0   ;;  %s677_s21 = smov 0  }
   0x2   :  { %s679_s22 = smov 0  }
   0x3 LB: > { %s27_s23 = sadd.s32 1, %s629_s20  ;;  %s34_s24 = sadd.s32 1, %s633_s21  ;;  %s637_s22 = sphi %s679_s22, %s15_s22   ;;  %s633_s21 = sphi %s677_s21, %s754_s21   ;;  %s629_s20 = sphi %s675_s20, %s753_s20   ;;  %s625_s19 = sphi %s673_s19, %s752_s19   ;;  %s621_s18 = sphi %s671_s18, %s751_s18  }
   0x4   : > { %p28_p0 = scmp.ge.s32.totalorder %s27_s23, 3  ;;  %p527_p1 = scmp.ge.s32.totalorder %s637_s22, 1 }
   0x5   : > { %p232_p2 = scmp.lt.s32.totalorder %s637_s22, 7 }
   0x6   : > { %s756_s23 = smov (%p28_p0, %s27_s23), 0  ;;  %s758_s24 = smov (!%p28_p0, %s34_s24), %s633_s21 }
   0x7   : > { %p233_p3 = pnand %p527_p1, %p232_p2  ;;  %p36_p4 = scmp.ge.s32.totalorder %s758_s24, 2 }
   0x8   : > { %p276_p5 = scmp.lt.s32.totalorder (!%p233_p3), %s625_s19, 1  ;;  %vm305_vm0 = vcmask (!%p233_p3), 261120   ;;  %p283_p6 = scmp.lt.s32.totalorder (!%p233_p3), %s621_s18, 2  ;;  %v639_v9 = vmov (!%p233_p3), 0.0   ;;  %vm640_vm1 = vmmov (!%p233_p3), 0   ;;  %vm404_vm2 = vcmask (!%p233_p3), 257024  }
   0x9   : > { %s760_s24 = smov (%p36_p4, %s758_s24), 0  ;;  %236 = sbr.rel (%p233_p3) target bundleno = 554 (0x22a), region = 40 }
   0xa   : > { %545 = vmatprep.subr.bf16.mxu0 (!%p233_p3), %v639_v9  ;;  %549 = vmatprep.mubr.msk.bf16.mxu0 (!%p233_p3), %vm640_vm1, %v639_v9  ;;  %v533_v15 = vld [vmem:[%s746_s1] ss:$0 sm:$0xff] (!%p233_p3) }
   0xb   : > { %v534_v17 = vld [vmem:[%s747_s2] ss:$0 sm:$0xff] (!%p233_p3) }
  0x10   : > { %s762_s19 = smov (!%p276_p5, %s625_s19), 1  ;;  %s764_s18 = smov (!%p283_p6, %s621_s18), 2 }
  0x11   : > { %s528_s25 = sshll.u32 %s762_s19, 2  ;;  %s541_s29 = sshll.u32 %s764_s18, 4 }
  0x12   : > { %s282_s28 = scalar_lea.vmem %s745_s0, %s528_s25  ;;  %s287_s7 = scalar_lea.vmem %s748_s3, %s541_s29 }
  0x13   : > { %v303_v0 = vld [vmem:[%s282_s28] sm:$0xf]  ;;  %v596_v10 = vld [vmem:[%s287_s7 + $0x8] sm:$0xff]   ;;  %s531_s12 = sshll.u32 %s764_s18, 1  ;;  %s290_s15 = scalar_lea.vmem %s749_s4, %s764_s18 }
  0x14   : > { %v304_v1 = vunpack.c.l.bf16 %v303_v0  ;;  %v595_v8 = vld [vmem:[%s287_s7] sm:$0xff]   ;;  %s299_s16 = sadd.s32 %s531_s12, %s762_s19 }
  0x15   : > { %546 = vmatpush3.bf16.msra.mxu0 %v595_v8  ;;  %v535_v21 = vld [vmem:[%s290_s15] ss:$0 sm:$0xff]  ;;  %s532_s17 = sshll.u32 %s299_s16, 2 }
  0x16   : > { %v306_v2 = vsel %vm305_vm0, %v304_v1, 0.0  ;;  %547 = vmatprep.subr.bf16.mxu0 %v639_v9  ;;  %s301_s27 = scalar_lea.vmem %s750_s5, %s532_s17 }
  0x17   : > { %307 = vadd.xlane.f32.xlu0 %v306_v2 }
  0x19   : > { %548 = vmatpush3.bf16.msra.mxu0 %v596_v10 }
  0xa4   : > { %v308_v3 = vpop.xlane.xlu0 %307 }
  0xa5   : > { %v310_v4 = vmul.f32 0.03125, %v308_v3 }
  0xa7   : > { %v311_v5 = vsub.f32 %v304_v1, %v310_v4 }
  0xa9   : > { %v312_v6 = vmul.f32 %v311_v5, %v311_v5 }
  0xab   : > { %v313_v7 = vsel %vm305_vm0, %v312_v6, 0.0 }
  0xac   : > { %314 = vadd.xlane.f32.xlu0 %v313_v7 }
 0x139   : > { %v315_v11 = vpop.xlane.xlu0 %314 }
 0x13a   : > { %v316_v12 = vmul.f32 0.03125, %v315_v11 }
 0x13c   : > { %v317_v13 = vadd.f32 1e-05, %v316_v12 }
 0x13e   : > { %597 = vrsqrt.f32 %v317_v13 }
 0x148   : > { %v598_v14 = vpop.eup %597 }
 0x149   : > { %v319_v16 = vmul.f32 %v598_v14, %v311_v5 }
 0x14b   : > { %v327_v18 = vmul.f32 %v533_v15, %v319_v16 }
 0x14d   : > { %v335_v19 = vadd.f32 %v534_v17, %v327_v18 }
 0x14f   : > { %v336_v20 = vpack.c.bf16 %v335_v19, %v335_v19 }
 0x151   : > { %550 = vmatmul.mubr.msk.bf16.vlgmr.msra.gmra.mrb[0].mxu0 %vm305_vm0, %v336_v20 }
 0x224   : > { %v397_v22 = vpop.f32.mrb[0].mxu0 }
 0x225   : > { %v398_v23 = vadd.f32 %v535_v21, %v397_v22  ;;  %v551_v24 = vpop.f32.mrb[1].mxu0 }
 0x226   : > { %v400_v25 = vpop.f32.mrb[2].mxu0 }
 0x227   : > { %v403_v26 = vpack.c.bf16 %v398_v23, %v398_v23  ;;  %v552_v27 = vpop.f32.mrb[3].mxu0 }
 0x229   : > { %405 = vst.msk [vmem:[%s301_s27] sm:$0xf] %vm404_vm2, %v403_v26 }
 0x22a PF: > { %s15_s22 = sadd.s32 1, %s637_s22   ;;  %s751_s18 = smov %s629_s20 }
 0x22b   : > { %p12_p7 = scmp.ge.s32.totalorder %s15_s22, 8   ;;  %s752_s19 = smov %s633_s21 }
 0x22c   : > { %s753_s20 = smov %s756_s23  ;;  %s754_s21 = smov %s760_s24 }
 0x22d   :  { %14 = sbr.rel (!%p12_p7) target bundleno = 3 (0x3), region = 76 }

// kernel: gpt_forward.13
= control target key start
LH: loop header
LB: loop body
LE: loop exit
PB: predicated region body
PF: predicated region fallthrough
CT: control target
= control target key end

     0   :  { %vm22_vm0 = vcmask 261120   ;;  %v163_v0 = vmov 0.0   ;;  %vm164_vm1 = vmmov 0   ;;  %vm127_vm2 = vcmask 257024   ;;  %s216_s1 = inlined_call_operand.vmem [shape: bf16[32,32], index: 1, kind: input, shape index: {}]   ;;  %s217_s0 = inlined_call_operand.vmem [shape: bf16[16,32], index: 0, kind: input, shape index: {}]   ;;  %s218_s3 = inlined_call_operand.vmem [shape: bf16[16,32], index: 3, kind: input, shape index: {}]   ;;  %s219_s2 = inlined_call_operand.vmem [shape: f32[1,32], index: 2, kind: input, shape index: {}]   ;;  %s220_s4 = inlined_call_operand.vmem [shape: bf16[16,32], index: 4, kind: output, shape index: {}]  }
   0x1   :  { %150 = vmatprep.subr.bf16.mxu0 %v163_v0  ;;  %v160_v1 = vld [vmem:[%s216_s1] sm:$0xff]   ;;  %154 = vmatprep.mubr.msk.bf16.mxu0 %vm164_vm1, %v163_v0  ;;  %23 = vst.msk [vmem:[#allocation2] sm:$0xff] %vm22_vm0, %v163_v0  ;;  %24 = vst.msk [vmem:[#allocation2 + $0x8] sm:$0xff] %vm22_vm0, %v163_v0  ;;  %v161_v2 = vld [vmem:[%s216_s1 + $0x8] sm:$0xff]  }
   0x2   :  { %151 = vmatpush3.bf16.msra.mxu0 %v160_v1  ;;  %v162_v3 = vld [vmem:[%s217_s0] sm:$0xff]  }
   0x3   :  { %152 = vmatprep.subr.bf16.mxu0 %v163_v0  ;;  %v144_v12 = vld [vmem:[%s218_s3] sm:$0xff]  }
   0x4   :  { %v138_v13 = vld [vmem:[%s219_s2] ss:$0 sm:$0xff]  ;;  %v145_v14 = vunpack.c.l.bf16 %v144_v12  ;;  %v146_v17 = vunpack.c.h.bf16 %v144_v12 }
   0x6   :  { %153 = vmatpush3.bf16.msra.mxu0 %v161_v2 }
   0x8   :  { %v25_v4 = vld [vmem:[#allocation2] sm:$0xff]  ;;  %v26_v6 = vld [vmem:[#allocation2 + $0x8] sm:$0xff] }
   0x9   :  { %155 = vmatmul.mubr.msk.bf16.vlgmr.msra.gmra.mrb[0].mxu0 %vm22_vm0, %v162_v3 }
  0xdc   :  { %v88_v5 = vpop.f32.mrb[0].mxu0 }
  0xdd   :  { %v95_v7 = vadd.f32 %v88_v5, %v25_v4  ;;  %v156_v8 = vpop.f32.mrb[1].mxu0 }
  0xde   :  { %v91_v9 = vpop.f32.mrb[2].mxu0 }
  0xdf   :  { %97 = vst.msk [vmem:[#allocation2] sm:$0xff] %vm22_vm0, %v95_v7  ;;  %v96_v10 = vadd.f32 %v91_v9, %v26_v6  ;;  %v157_v11 = vpop.f32.mrb[3].mxu0 }
  0xe1   :  { %98 = vst.msk [vmem:[#allocation2 + $0x8] sm:$0xff] %vm22_vm0, %v96_v10 }
  0xe6   :  { %v102_v15 = vld [vmem:[#allocation2] sm:$0xff] }
  0xe7   :  { %v111_v16 = vadd.f32 %v138_v13, %v102_v15 }
  0xe8   :  { %v103_v18 = vld [vmem:[#allocation2 + $0x8] sm:$0xff] }
  0xe9   :  { %v117_v19 = vadd.f32 %v145_v14, %v111_v16  ;;  %v112_v20 = vadd.f32 %v138_v13, %v103_v18 }
  0xeb   :  { %v141_v21 = vpack.c.bf16 %v117_v19, %v117_v19  ;;  %v118_v22 = vadd.f32 %v146_v17, %v112_v20 }
  0xed   :  { %128 = vst.msk [vmem:[%s220_s4] sm:$0xf] %vm127_vm2, %v141_v21  ;;  %v142_v23 = vpack.c.bf16 %v118_v22, %v118_v22 }
  0xef   :  { %129 = vst.msk [vmem:[%s220_s4 + $0x4] sm:$0xf] %vm127_vm2, %v142_v23 }

// kernel: gpt_forward.12
= control target key start
LH: loop header
LB: loop body
LE: loop exit
PB: predicated region body
PF: predicated region fallthrough
CT: control target
= control target key end

     0   :  { %s1234_s12 = smov 0   ;;  %s1236_s13 = smov 0   ;;  %s1435_s0 = inlined_call_operand.vmem [shape: bf16[3,2,8,32], index: 0, kind: input, shape index: {}, may-alias: {0,1,2}]   ;;  %s1436_s1 = inlined_call_operand.vmem [shape: bf16[3,2,8,32], index: 1, kind: input, shape index: {}, may-alias: {0,1,2}]   ;;  %s1437_s2 = inlined_call_operand.vmem [shape: bf16[3,2,8,32], index: 2, kind: input, shape index: {}, may-alias: {0,1,2}]   ;;  %s1438_s3 = inlined_call_operand.vmem [shape: bf16[2,8,32], index: 3, kind: output, shape index: {}]  }
   0x1   :  { %s1238_s14 = smov 0  }
   0x2 LB: > { %s32_s15 = sadd.s32 1, %s1195_s13  ;;  %p1023_p0 = scmp.ge.s32.totalorder %s1199_s14, 1  ;;  %s1199_s14 = sphi %s1238_s14, %s13_s14   ;;  %s1195_s13 = sphi %s1236_s13, %s1440_s13   ;;  %s1191_s12 = sphi %s1234_s12, %s1439_s12  }
   0x3   : > { %p34_p1 = scmp.ge.s32.totalorder %s32_s15, 2  ;;  %p192_p2 = scmp.lt.s32.totalorder %s1199_s14, 3 }
   0x5   : > { %s1442_s15 = smov (%p34_p1, %s32_s15), 0  ;;  %p193_p3 = pnand %p1023_p0, %p192_p2 }
   0x6   : > { %p236_p4 = scmp.lt.s32.totalorder (!%p193_p3), %s1191_s12, 1  ;;  %v1201_v0 = vmov (!%p193_p3), 0.0   ;;  %vm1202_vm0 = vmmov (!%p193_p3), 0   ;;  %vm295_vm1 = vcmask (!%p193_p3), 64512   ;;  %vm271_vm2 = vcmask (!%p193_p3), 31744   ;;  %s1205_s23 = smov (!%p193_p3), 120  }
   0x7   : > { %196 = sbr.rel (%p193_p3) target bundleno = 1421 (0x58d), region = 32  ;;  %1059 = vmatprep.subr.bf16.mxu0 (!%p193_p3), %v1201_v0  ;;  %1061 = vmatprep.mubr.msk.bf16.mxu0 (!%p193_p3), %vm1202_vm0, %v1201_v0  ;;  %v1203_v4 = vmov (!%p193_p3), -1e+30   ;;  %273 = vst.msk [vmem:[#allocation3] sm:$0xff] (!%p193_p3), %vm271_vm2, %v1201_v0  ;;  %v286_v5 = vlaneseq (!%p193_p3)  ;;  %v1204_v15 = vmov (!%p193_p3), 0   ;;  %s1206_s24 = smov (!%p193_p3), 112  }
   0x8   : > { %1065 = vmatprep.subr.bf16.mxu1 (!%p193_p3), %v1201_v0  ;;  %1067 = vmatprep.mubr.msk.bf16.mxu1 (!%p193_p3), %vm1202_vm0, %v1201_v0  ;;  %272 = vst.msk [vmem:[#allocation2] sm:$0xff] (!%p193_p3), %vm271_vm2, %v1203_v4  ;;  %s1207_s25 = smov (!%p193_p3), 104   ;;  %vm366_vm4 = vcmask (!%p193_p3), 7168   ;;  %vm379_vm5 = vcmask (!%p193_p3), 1043456   ;;  %v1208_v63 = vmov (!%p193_p3), 1   ;;  %vm506_vm6 = vcmask (!%p193_p3), 15368  }
   0x9   : > { %v1274_v6 = vshrl.u32 (!%p193_p3), %v286_v5, 7  ;;  %v1276_v7 = vand.u32 (!%p193_p3), 127, %v286_v5  ;;  %1144 = vset.pattern.permute.xlu0 (!%p193_p3), %v1204_v15  ;;  %1145 = vset.pattern.permute.xlu1 (!%p193_p3), %v1208_v63  ;;  %vm274_vm7 = vcmask (!%p193_p3), 261120   ;;  %vm649_vm8 = vcmask (!%p193_p3), 23568   ;;  %s1211_s29 = smov (!%p193_p3), 8   ;;  %s1212_s30 = smov (!%p193_p3), 16  }
   0xa   : > { %275 = vst.msk [vmem:[#allocation4] sm:$0xff] (!%p193_p3), %vm274_vm7, %v1201_v0  ;;  %vm789_vm9 = vcmask (!%p193_p3), 31768   ;;  %s1213_s4 = smov (!%p193_p3), 24   ;;  %vm572_vm10 = vcmask (!%p193_p3), 130112   ;;  %vm712_vm11 = vcmask (!%p193_p3), 195712   ;;  %vm852_vm12 = vcmask (!%p193_p3), 261312  }
   0xb   : > { %vm294_vm3 = vcmp.ge.s32.totalorder (!%p193_p3), %v1274_v6, %v1276_v7  ;;  %vm868_vm13 = vcmask (!%p193_p3), 60416   ;;  %vm880_vm14 = vcmask (!%p193_p3), 126016   ;;  %vm892_vm15 = vcmask (!%p193_p3), 191616  }
   0xe   : > { %s1444_s12 = smov (!%p236_p4, %s1191_s12), 1 }
   0xf   : > { %s1258_s16 = sshll.u32 %s1444_s12, 2  ;;  %v1291_v18 = vld [vmem:[#allocation2] sm:$0xff] }
  0x10   : > { %s961_s19 = scalar_lea.vmem %s1436_s1, %s1258_s16  ;;  %s242_s22 = scalar_lea.vmem %s1435_s0, %s1258_s16 }
  0x11   : > { %v1028_v1 = vld [vmem:[%s961_s19 + $0x8] sm:$0xf]  ;;  %v283_v3 = vld [vmem:[%s242_s22] sm:$0xf]  ;;  %s965_s28 = scalar_lea.vmem %s1437_s2, %s1258_s16  ;;  %s265_s7 = scalar_lea.vmem %s1438_s3, %s1258_s16 }
  0x12   : > { %v300_v2 = vsel %vm295_vm1, %v1028_v1, 0  ;;  %v1033_v16 = vcombine.low %v1028_v1, %v1028_v1  ;;  %v1032_v17 = vcombine.low %v283_v3, %v283_v3  ;;  %v1305_v22 = vld [vmem:[%s965_s28 + $0x10] sm:$0xf]  ;;  %v1209_v1 = vmov 2  }
  0x13   : > { %1060 = vmatpush3.bf16.xpose.msra.mxu0 %v300_v2  ;;  %v381_v23 = vsel %vm379_vm5, %v1305_v22, 0  ;;  %v1035_v6 = vcombine.low %v1305_v22, %v1305_v22 }
  0x14   : > { %1077 = vmatprep.subr.bf16.mxu0 %v1201_v0  ;;  %434 = vrot.lane.b32.xlu1 %v1033_v16, %s1205_s23 }
  0x15   : > { %1066 = vmatpush3.bf16.msra.mxu1 %v381_v23 }
  0x16   : > { %1071 = vmatprep.subr.bf16.mxu1 %v1201_v0 }
  0x18   : > { %429 = vrot.lane.b32.xlu1 %v1032_v17, %s1205_s23 }
  0x1a   : > { %1062 = vmatmul.mubr.msk.bf16.vlgmr.msra.gmra.mrb[0].mxu0 %vm295_vm1, %v283_v3 }
  0x1b   : > { %1079 = vmatprep.mubr.msk.bf16.mxu0 %vm1202_vm0, %v1201_v0 }
  0x1c   : > { %577 = vrot.lane.b32.xlu1 %v1033_v16, %s1206_s24 }
  0x20   : > { %575 = vrot.lane.b32.xlu1 %v1032_v17, %s1206_s24 }
  0x24   : > { %717 = vrot.lane.b32.xlu1 %v1033_v16, %s1207_s25 }
  0x28   : > { %715 = vrot.lane.b32.xlu1 %v1032_v17, %s1207_s25 }
  0x86   : > { %v435_v27 = vpop.permute.xlu1 %434 }
  0x87   : > { %v440_v30 = vsel %vm295_vm1, %v435_v27, 0 }
  0x8a   : > { %v430_v28 = vpop.permute.xlu1 %429 }
  0x8e   : > { %v578_v32 = vpop.permute.xlu1 %577 }
  0x8f   : > { %v583_v34 = vsel %vm295_vm1, %v578_v32, 0 }
  0x92   : > { %v576_v33 = vpop.permute.xlu1 %575 }
  0x96   : > { %v718_v35 = vpop.permute.xlu1 %717 }
  0x97   : > { %v723_v36 = vsel %vm295_vm1, %v718_v35, 0 }
  0x9a   : > { %v716_v37 = vpop.permute.xlu1 %715 }
  0xed   : > { %v336_v8 = vpop.f32.mrb[0].mxu0 }
  0xee   : > { %v342_v9 = vmul.f32 0.35355338, %v336_v8  ;;  %v1063_v10 = vpop.f32.mrb[1].mxu0  ;;  %v1210_v8 = vmov 3  }
  0xef   : > { %v339_v11 = vpop.f32.mrb[2].mxu0 }
  0xf0   : > { %v1064_v12 = vpop.f32.mrb[3].mxu0  ;;  %v343_v13 = vsel %vm294_vm3, %v342_v9, -1e+30 }
  0xf1   : > { %v345_v14 = vsel %vm295_vm1, %v343_v13, -inf }
  0xf2   : > { %346 = vmax.xlane.f32.xlu0 %v345_v14 }
 0x17f   : > { %v347_v19 = vpop.xlane.xlu0 %346 }
 0x180   : > { %v1294_v20 = vmax.f32 %v1291_v18, %v347_v19 }
 0x182   : > { %v349_v21 = vsub.f32 %v1291_v18, %v1294_v20  ;;  %425 = vst.msk [vmem:[#allocation2] sm:$0xff] %vm366_vm4, %v1294_v20  ;;  %354 = vperm.xlu0 %1144, %v1294_v20  }
 0x184   : > { %v350_v5 = vmul.f32 1.442695, %v349_v21 }
 0x186   : > { %1146 = vset.pattern.permute.xlu0 %v1209_v1 }
 0x189   : > { %v484_v3 = vld [vmem:[#allocation2] sm:$0xff] }
 0x201   : > { %v355_v24 = vpop.permute.xlu0 %354 }
 0x202   : > { %v357_v25 = vsub.f32 %v343_v13, %v355_v24 }
 0x204   : > { %v358_v26 = vmul.f32 1.442695, %v357_v25 }
 0x206   : > { %1159 = vpow2.f32 %v358_v26 }
 0x207   : > { %1161 = vpow2.f32 %v350_v5 }
 0x210   : > { %v1310_v29 = vpop.eup %1159 }
 0x211   : > { %v375_v31 = vpack.c.bf16 %v1310_v29, %v1310_v29  ;;  %v1368_v13 = vpop.eup %1161  ;;  %v362_v19 = vsel %vm295_vm1, %v1310_v29, 0.0 }
 0x213   : > { %1068 = vmatmul.mubr.msk.bf16.vlgmr.msra.gmra.mrb[0].mxu1 %vm295_vm1, %v375_v31 }
 0x214   : > { %1072 = vmatpush3.bf16.xpose.msra.mxu1 %v440_v30  ;;  %1073 = vmatprep.mubr.msk.bf16.mxu1 %vm1202_vm0, %v1201_v0  ;;  %v368_v30 = vld [vmem:[#allocation4] sm:$0xff] }
 0x215   : > { %1083 = vmatprep.subr.bf16.mxu1 %v1201_v0 }
 0x21b   : > { %1074 = vmatmul.mubr.msk.bf16.vlgmr.msra.gmra.mrb[4].mxu1 %vm295_vm1, %v430_v28 }
 0x21c   : > { %1084 = vmatpush3.bf16.xpose.msra.mxu1 %v583_v34  ;;  %1085 = vmatprep.mubr.msk.bf16.mxu1 %vm1202_vm0, %v1201_v0 }
 0x21d   : > { %1095 = vmatprep.subr.bf16.mxu1 %v1201_v0 }
 0x223   : > { %1086 = vmatmul.mubr.msk.bf16.vlgmr.msra.gmra.mrb[8].mxu1 %vm295_vm1, %v576_v33 }
 0x224   : > { %1096 = vmatpush3.bf16.xpose.msra.mxu1 %v723_v36  ;;  %1097 = vmatprep.mubr.msk.bf16.mxu1 %vm1202_vm0, %v1201_v0 }
 0x22b   : > { %1098 = vmatmul.mubr.msk.bf16.vlgmr.msra.gmra.mrb[12].mxu1 %vm295_vm1, %v716_v37 }
 0x2e6   : > { %v1329_v38 = vpop.f32.mrb[0].mxu1 }
 0x2e7   : > { %v1069_v39 = vpop.f32.mrb[1].mxu1 }
 0x2e8   : > { %v420_v40 = vpop.f32.mrb[2].mxu1 }
 0x2e9   : > { %v1070_v41 = vpop.f32.mrb[3].mxu1 }
 0x2ee   : > { %v476_v42 = vpop.f32.mrb[4].mxu1 }
 0x2ef   : > { %v482_v43 = vmul.f32 0.35355338, %v476_v42  ;;  %v1075_v44 = vpop.f32.mrb[5].mxu1 }
 0x2f0   : > { %v479_v45 = vpop.f32.mrb[6].mxu1 }
 0x2f1   : > { %v1076_v46 = vpop.f32.mrb[7].mxu1  ;;  %v1334_v47 = vsel %vm294_vm3, %v482_v43, -1e+30 }
 0x2f2   : > { %v485_v48 = vsel %vm295_vm1, %v1334_v47, -inf }
 0x2f3   : > { %486 = vmax.xlane.f32.xlu1 %v485_v48 }
 0x2f6   : > { %v619_v49 = vpop.f32.mrb[8].mxu1 }
 0x2f7   : > { %v625_v50 = vmul.f32 0.35355338, %v619_v49  ;;  %v1087_v51 = vpop.f32.mrb[9].mxu1 }
 0x2f8   : > { %v622_v52 = vpop.f32.mrb[10].mxu1 }
 0x2f9   : > { %v1088_v53 = vpop.f32.mrb[11].mxu1  ;;  %v1341_v54 = vsel %vm294_vm3, %v625_v50, -1e+30  ;;  %v360_v52 = vld [vmem:[#allocation3] sm:$0xff] }
 0x2fa   : > { %v628_v55 = vsel %vm295_vm1, %v1341_v54, -inf  ;;  %v361_v53 = vmul.f32 %v1368_v13, %v360_v52 }
 0x2fb   : > { %629 = vmax.xlane.f32.xlu0 %v628_v55 }
 0x2fe   : > { %v759_v56 = vpop.f32.mrb[12].mxu1 }
 0x2ff   : > { %v765_v57 = vmul.f32 0.35355338, %v759_v56  ;;  %v1099_v58 = vpop.f32.mrb[13].mxu1 }
 0x300   : > { %v762_v59 = vpop.f32.mrb[14].mxu1 }
 0x301   : > { %v1100_v60 = vpop.f32.mrb[15].mxu1  ;;  %v1348_v61 = vsel %vm294_vm3, %v765_v57, -1e+30 }
 0x302   : > { %v768_v62 = vsel %vm295_vm1, %v1348_v61, -inf }
 0x303   : > { %769 = vmax.xlane.f32.xlu1 %v768_v62 }
 0x380   : > { %v487_v2 = vpop.xlane.xlu1 %486 }
 0x381   : > { %v488_v4 = vmax.f32 %v484_v3, %v487_v2 }
 0x383   : > { %v489_v7 = vsub.f32 %v484_v3, %v488_v4  ;;  %574 = vst.msk [vmem:[#allocation2] sm:$0xff] %vm506_vm6, %v488_v4  ;;  %494 = vperm.xlu1 %1145, %v488_v4  }
 0x385   : > { %v490_v20 = vmul.f32 1.442695, %v489_v7 }
 0x387   : > { %519 = vrot.lane.b32.xlu1 %v1035_v6, %s1205_s23  ;;  %1163 = vpow2.f32 %v490_v20 }
 0x388   : > { %1147 = vset.pattern.permute.xlu1 %v1210_v8  ;;  %v630_v9 = vpop.xlane.xlu0 %629 }
 0x38a   : > { %v1362_v10 = vld [vmem:[#allocation2] sm:$0xff] }
 0x38b   : > { %v631_v11 = vmax.f32 %v1362_v10, %v630_v9 }
 0x38d   : > { %v632_v12 = vsub.f32 %v1362_v10, %v631_v11  ;;  %714 = vst.msk [vmem:[#allocation2] sm:$0xff] %vm649_vm8, %v631_v11  ;;  %637 = vperm.xlu0 %1146, %v631_v11  }
 0x38f   : > { %v633_v46 = vmul.f32 1.442695, %v632_v12 }
 0x390   : > { %v770_v14 = vpop.xlane.xlu1 %769 }
 0x391   : > { %1148 = vset.pattern.permute.xlu0 %v1204_v15  ;;  %v1164_v21 = vpop.eup %1163 }
 0x392   : > { %371 = vperm.xlu0 %1148, %v1368_v13  }
 0x394   : > { %v1372_v16 = vld [vmem:[#allocation2] sm:$0xff] }
 0x395   : > { %v1375_v17 = vmax.f32 %v1372_v16, %v770_v14 }
 0x396   : > { %1151 = vset.pattern.permute.xlu0 %v1210_v8 }
 0x397   : > { %v772_v18 = vsub.f32 %v1372_v16, %v1375_v17  ;;  %854 = vst.msk [vmem:[#allocation2] sm:$0xff] %vm789_vm9, %v1375_v17  ;;  %777 = vperm.xlu1 %1147, %v1375_v17  }
 0x399   : > { %v773_v59 = vmul.f32 1.442695, %v772_v18 }
 0x39b   : > { %659 = vrot.lane.b32.xlu1 %v1035_v6, %s1206_s24 }
 0x39c   : > { %1149 = vset.pattern.permute.xlu1 %v1208_v63 }
 0x39f   : > { %799 = vrot.lane.b32.xlu1 %v1035_v6, %s1207_s25 }
 0x3c3   : > { %363 = vadd.xlane.f32.xlu1 %v362_v19 }
 0x3d4   : > { %511 = vperm.xlu1 %1149, %v1164_v21  }
 0x3d8   : > { %1150 = vset.pattern.permute.xlu1 %v1209_v1 }
 0x402   : > { %v495_v22 = vpop.permute.xlu1 %494 }
 0x403   : > { %v497_v23 = vsub.f32 %v1334_v47, %v495_v22 }
 0x405   : > { %v498_v24 = vmul.f32 1.442695, %v497_v23 }
 0x406   : > { %v520_v25 = vpop.permute.xlu1 %519 }
 0x407   : > { %1165 = vpow2.f32 %v498_v24  ;;  %v525_v26 = vsel %vm379_vm5, %v520_v25, 0 }
 0x408   : > { %1078 = vmatpush3.bf16.msra.mxu0 %v525_v26 }
 0x409   : > { %1089 = vmatprep.subr.bf16.mxu0 %v1201_v0 }
 0x40c   : > { %v638_v27 = vpop.permute.xlu0 %637 }
 0x40d   : > { %v640_v28 = vsub.f32 %v1341_v54, %v638_v27 }
 0x40f   : > { %v641_v29 = vmul.f32 1.442695, %v640_v28 }
 0x411   : > { %v1166_v31 = vpop.eup %1165  ;;  %1167 = vpow2.f32 %v641_v29  ;;  %v372_v32 = vpop.permute.xlu0 %371 }
 0x412   : > { %v374_v33 = vmul.f32 %v372_v32, %v368_v30  ;;  %v502_v34 = vsel %vm295_vm1, %v1166_v31, 0.0  ;;  %v515_v35 = vpack.c.bf16 %v1166_v31, %v1166_v31 }
 0x413   : > { %503 = vadd.xlane.f32.xlu0 %v502_v34 }
 0x414   : > { %v423_v36 = vadd.f32 %v1329_v38, %v374_v33  ;;  %1080 = vmatmul.mubr.msk.bf16.vlgmr.msra.gmra.mrb[4].mxu0 %vm295_vm1, %v515_v35 }
 0x415   : > { %1091 = vmatprep.mubr.msk.bf16.mxu0 %vm1202_vm0, %v1201_v0 }
 0x416   : > { %424 = vst.msk [vmem:[#allocation4] sm:$0xff] %vm295_vm1, %v423_v36  ;;  %v778_v37 = vpop.permute.xlu1 %777 }
 0x417   : > { %v780_v39 = vsub.f32 %v1348_v61, %v778_v37 }
 0x419   : > { %v781_v40 = vmul.f32 1.442695, %v780_v39 }
 0x41a   : > { %v660_v41 = vpop.permute.xlu1 %659 }
 0x41b   : > { %v1168_v42 = vpop.eup %1167  ;;  %1169 = vpow2.f32 %v781_v40  ;;  %v665_v43 = vsel %vm379_vm5, %v660_v41, 0 }
 0x41c   : > { %1090 = vmatpush3.bf16.msra.mxu0 %v665_v43  ;;  %v645_v44 = vsel %vm295_vm1, %v1168_v42, 0.0  ;;  %v658_v38 = vpack.c.bf16 %v1168_v42, %v1168_v42  ;;  %1171 = vpow2.f32 %v633_v46 }
 0x41d   : > { %646 = vadd.xlane.f32.xlu1 %v645_v44  ;;  %1101 = vmatprep.subr.bf16.mxu0 %v1201_v0  ;;  %1173 = vpow2.f32 %v773_v59  ;;  %v508_v23 = vld [vmem:[#allocation4] sm:$0xff] }
 0x41e   : > { %v800_v45 = vpop.permute.xlu1 %799 }
 0x41f   : > { %1092 = vmatmul.mubr.msk.bf16.vlgmr.msra.gmra.mrb[8].mxu0 %vm295_vm1, %v658_v38  ;;  %v805_v47 = vsel %vm379_vm5, %v800_v45, 0 }
 0x420   : > { %1102 = vmatpush3.bf16.msra.mxu0 %v805_v47  ;;  %1103 = vmatprep.mubr.msk.bf16.mxu0 %vm1202_vm0, %v1201_v0  ;;  %vm904_vm0 = vcmask 257216  }
 0x425   : > { %v1170_v48 = vpop.eup %1169 }
 0x426   : > { %v785_v49 = vsel %vm295_vm1, %v1170_v48, 0.0  ;;  %v798_v50 = vpack.c.bf16 %v1170_v48, %v1170_v48  ;;  %v1172_v51 = vpop.eup %1171 }
 0x427   : > { %786 = vadd.xlane.f32.xlu0 %v785_v49  ;;  %v1174_v3 = vpop.eup %1173 }
 0x428   : > { %1104 = vmatmul.mubr.msk.bf16.vlgmr.msra.gmra.mrb[12].mxu0 %vm295_vm1, %v798_v50 }
 0x42e   : > { %654 = vperm.xlu1 %1150, %v1172_v51  }
 0x432   : > { %1152 = vset.pattern.permute.xlu1 %v1204_v15 }
 0x450   : > { %v364_v54 = vpop.xlane.xlu1 %363 }
 0x451   : > { %v365_v55 = vadd.f32 %v364_v54, %v361_v53 }
 0x453   : > { %367 = vst.msk [vmem:[#allocation3] sm:$0xff] %vm366_vm4, %v365_v55 }
 0x454   : > { %v512_v60 = vpop.permute.xlu1 %511 }
 0x455   : > { %v514_v24 = vmul.f32 %v512_v60, %v508_v23 }
 0x45a   : > { %v500_v0 = vld [vmem:[#allocation3] sm:$0xff] }
 0x45b   : > { %v501_v56 = vmul.f32 %v1164_v21, %v500_v0 }
 0x4a0   : > { %v504_v57 = vpop.xlane.xlu0 %503 }
 0x4a1   : > { %v505_v58 = vadd.f32 %v504_v57, %v501_v56 }
 0x4a3   : > { %507 = vst.msk [vmem:[#allocation3] sm:$0xff] %vm506_vm6, %v505_v58 }
 0x4aa   : > { %v643_v61 = vld [vmem:[#allocation3] sm:$0xff]  ;;  %v647_v62 = vpop.xlane.xlu1 %646 }
 0x4ab   : > { %v644_v15 = vmul.f32 %v1172_v51, %v643_v61 }
 0x4ad   : > { %v648_v2 = vadd.f32 %v647_v62, %v644_v15 }
 0x4ae   : > { %v655_v27 = vpop.permute.xlu1 %654 }
 0x4af   : > { %650 = vst.msk [vmem:[#allocation3] sm:$0xff] %vm649_vm8, %v648_v2 }
 0x4b4   : > { %v787_v6 = vpop.xlane.xlu0 %786 }
 0x4b6   : > { %v783_v4 = vld [vmem:[#allocation3] sm:$0xff] }
 0x4b7   : > { %v784_v5 = vmul.f32 %v1174_v3, %v783_v4 }
 0x4b9   : > { %v788_v7 = vadd.f32 %v787_v6, %v784_v5 }
 0x4bb   : > { %790 = vst.msk [vmem:[#allocation3] sm:$0xff] %vm789_vm9, %v788_v7 }
 0x4c2   : > { %v858_v9 = vld [vmem:[#allocation3] sm:$0xff] }
 0x4c3   : > { %1175 = vrcp.f32 %v858_v9 }
 0x4cd   : > { %v1176_v10 = vpop.eup %1175 }
 0x4ce   : > { %863 = vperm.xlu1 %1152, %v1176_v10  }
 0x4d2   : > { %1154 = vset.pattern.permute.xlu1 %v1209_v1 }
 0x4d3   : > { %887 = vperm.xlu1 %1154, %v1176_v10  }
 0x4d7   : > { %1155 = vset.pattern.permute.xlu1 %v1210_v8 }
 0x4d8   : > { %899 = vperm.xlu1 %1155, %v1176_v10  }
 0x4e7   : > { %v561_v11 = vpop.f32.mrb[4].mxu0 }
 0x4e8   : > { %568 = vrot.lane.b32.xlu0 %v561_v11, %s1211_s29  ;;  %v1081_v12 = vpop.f32.mrb[5].mxu0 }
 0x4e9   : > { %v564_v13 = vpop.f32.mrb[6].mxu0 }
 0x4ea   : > { %v1082_v14 = vpop.f32.mrb[7].mxu0 }
 0x4f2   : > { %v701_v16 = vpop.f32.mrb[8].mxu0 }
 0x4f3   : > { %708 = vrot.lane.b32.xlu0 %v701_v16, %s1212_s30  ;;  %v1093_v17 = vpop.f32.mrb[9].mxu0 }
 0x4f4   : > { %v704_v18 = vpop.f32.mrb[10].mxu0 }
 0x4f5   : > { %v1094_v19 = vpop.f32.mrb[11].mxu0 }
 0x4f7   : > { %794 = vperm.xlu0 %1151, %v1174_v3  }
 0x4fb   : > { %v841_v20 = vpop.f32.mrb[12].mxu0  ;;  %1153 = vset.pattern.permute.xlu0 %v1208_v63 }
 0x4fc   : > { %848 = vrot.lane.b32.xlu0 %v841_v20, %s1213_s4  ;;  %v1105_v1 = vpop.f32.mrb[13].mxu0 }
 0x4fd   : > { %v844_v21 = vpop.f32.mrb[14].mxu0 }
 0x4fe   : > { %v1106_v22 = vpop.f32.mrb[15].mxu0 }
 0x500   : > { %875 = vperm.xlu0 %1153, %v1176_v10  }
 0x504   : > { %1156 = vset.pattern.permute.xlu0 %v1210_v8 }
 0x54d   : > { %v864_v33 = vpop.permute.xlu1 %863 }
 0x552   : > { %v888_v36 = vpop.permute.xlu1 %887 }
 0x557   : > { %v900_v40 = vpop.permute.xlu1 %899 }
 0x55a   : > { %v569_v25 = vpop.permute.xlu0 %568 }
 0x55b   : > { %v571_v26 = vadd.f32 %v569_v25, %v514_v24 }
 0x55d   : > { %573 = vst.msk [vmem:[#allocation4] sm:$0xff] %vm572_vm10, %v571_v26 }
 0x564   : > { %v651_v28 = vld [vmem:[#allocation4] sm:$0xff] }
 0x565   : > { %v657_v29 = vmul.f32 %v655_v27, %v651_v28  ;;  %v709_v30 = vpop.permute.xlu0 %708 }
 0x567   : > { %v711_v63 = vadd.f32 %v709_v30, %v657_v29 }
 0x569   : > { %713 = vst.msk [vmem:[#allocation4] sm:$0xff] %vm712_vm11, %v711_v63 }
 0x570   : > { %v791_v32 = vld [vmem:[#allocation4] sm:$0xff] }
 0x576   : > { %v795_v31 = vpop.permute.xlu0 %794 }
 0x577   : > { %v797_v34 = vmul.f32 %v795_v31, %v791_v32 }
 0x57a   : > { %v849_v8 = vpop.permute.xlu0 %848 }
 0x57b   : > { %v851_v35 = vadd.f32 %v849_v8, %v797_v34 }
 0x57d   : > { %853 = vst.msk [vmem:[#allocation4] sm:$0xff] %vm852_vm12, %v851_v35 }
 0x57f   : > { %v876_v39 = vpop.permute.xlu0 %875 }
 0x584   : > { %v860_v37 = vld [vmem:[#allocation4] sm:$0xff] }
 0x585   : > { %v866_v41 = vmul.f32 %v864_v33, %v860_v37  ;;  %v890_v42 = vmul.f32 %v888_v36, %v860_v37  ;;  %v878_v43 = vmul.f32 %v876_v39, %v860_v37  ;;  %v902_v44 = vmul.f32 %v900_v40, %v860_v37 }
 0x587   : > { %v867_v38 = vpack.c.bf16 %v866_v41, %v866_v41  ;;  %v879_v45 = vpack.c.bf16 %v878_v43, %v878_v43  ;;  %v891_v46 = vpack.c.bf16 %v890_v42, %v890_v42  ;;  %v903_v47 = vpack.c.bf16 %v902_v44, %v902_v44 }
 0x589   : > { %869 = vst.msk [vmem:[%s265_s7] sm:$0xf] %vm868_vm13, %v867_v38 }
 0x58a   : > { %881 = vst.msk [vmem:[%s265_s7] sm:$0xf] %vm880_vm14, %v879_v45 }
 0x58b   : > { %893 = vst.msk [vmem:[%s265_s7] sm:$0xf] %vm892_vm15, %v891_v46 }
 0x58c   : > { %905 = vst.msk [vmem:[%s265_s7] sm:$0xf] %vm904_vm0, %v903_v47 }
 0x58d PF: > { %s13_s14 = sadd.s32 1, %s1199_s14   ;;  %s1439_s12 = smov %s1195_s13 }
 0x58e   : > { %p10_p5 = scmp.ge.s32.totalorder %s13_s14, 4   ;;  %s1440_s13 = smov %s1442_s15 }
 0x590   :  { %12 = sbr.rel (!%p10_p5) target bundleno = 2 (0x2), region = 80 }

// kernel: gpt_forward.15
= control target key start
LH: loop header
LB: loop body
LE: loop exit
PB: predicated region body
PF: predicated region fallthrough
CT: control target
= control target key end

     0   :  { %vm22_vm0 = vcmask 261120   ;;  %v190_v0 = vmov 0.0   ;;  %vm191_vm1 = vmmov 0   ;;  %vm66_vm2 = vcmask 523264   ;;  %s248_s1 = inlined_call_operand.vmem [shape: bf16[64,32], index: 1, kind: input, shape index: {}]   ;;  %s249_s0 = inlined_call_operand.vmem [shape: bf16[16,64], index: 0, kind: input, shape index: {}]   ;;  %s250_s3 = inlined_call_operand.vmem [shape: bf16[16,32], index: 3, kind: input, shape index: {}]   ;;  %s251_s2 = inlined_call_operand.vmem [shape: f32[1,32], index: 2, kind: input, shape index: {}]   ;;  %s252_s4 = inlined_call_operand.vmem [shape: bf16[16,32], index: 4, kind: output, shape index: {}]  }
   0x1   :  { %171 = vmatprep.subr.bf16.mxu0 %v190_v0  ;;  %v185_v1 = vld [vmem:[%s248_s1] sm:$0xff]   ;;  %179 = vmatprep.mubr.msk.bf16.mxu0 %vm191_vm1, %v190_v0  ;;  %23 = vst.msk [vmem:[#allocation2] sm:$0xff] %vm22_vm0, %v190_v0  ;;  %24 = vst.msk [vmem:[#allocation2 + $0x8] sm:$0xff] %vm22_vm0, %v190_v0  ;;  %v186_v2 = vld [vmem:[%s248_s1 + $0x8] sm:$0xff]   ;;  %vm144_vm3 = vcmask 257024  }
   0x2   :  { %172 = vmatpush3.bf16.msra.mxu0 %v185_v1  ;;  %v187_v3 = vld [vmem:[%s248_s1 + $0x10] sm:$0xff]   ;;  %v188_v4 = vld [vmem:[%s248_s1 + $0x18] sm:$0xff]   ;;  %v189_v5 = vld [vmem:[%s249_s0] sm:$0xff]  }
   0x3   :  { %173 = vmatprep.subr.bf16.mxu0 %v190_v0  ;;  %v163_v14 = vld [vmem:[%s250_s3] sm:$0xff]  }
   0x4   :  { %v157_v15 = vld [vmem:[%s251_s2] ss:$0 sm:$0xff]  ;;  %v164_v16 = vunpack.c.l.bf16 %v163_v14  ;;  %v165_v19 = vunpack.c.h.bf16 %v163_v14 }
   0x6   :  { %174 = vmatpush3.bf16.msra.mxu0 %v186_v2 }
   0x7   :  { %175 = vmatprep.subr.bf16.mxu0 %v190_v0 }
   0x8   :  { %v25_v6 = vld [vmem:[#allocation2] sm:$0xff]  ;;  %v26_v8 = vld [vmem:[#allocation2 + $0x8] sm:$0xff] }
   0xa   :  { %176 = vmatpush3.bf16.msra.mxu0 %v187_v3 }
   0xb   :  { %177 = vmatprep.subr.bf16.mxu0 %v190_v0 }
   0xe   :  { %178 = vmatpush3.bf16.msra.mxu0 %v188_v4 }
  0x11   :  { %180 = vmatmul.mubr.msk.bf16.vlgmr.msra.gmra.mrb[0].mxu0 %vm66_vm2, %v189_v5 }
  0xe4   :  { %v104_v7 = vpop.f32.mrb[0].mxu0 }
  0xe5   :  { %v111_v9 = vadd.f32 %v104_v7, %v25_v6  ;;  %v181_v10 = vpop.f32.mrb[1].mxu0 }
  0xe6   :  { %v107_v11 = vpop.f32.mrb[2].mxu0 }
  0xe7   :  { %114 = vst.msk [vmem:[#allocation2] sm:$0xff] %vm22_vm0, %v111_v9  ;;  %v112_v12 = vadd.f32 %v107_v11, %v26_v8  ;;  %v182_v13 = vpop.f32.mrb[3].mxu0 }
  0xe9   :  { %115 = vst.msk [vmem:[#allocation2 + $0x8] sm:$0xff] %vm22_vm0, %v112_v12 }
  0xee   :  { %v119_v17 = vld [vmem:[#allocation2] sm:$0xff] }
  0xef   :  { %v128_v18 = vadd.f32 %v157_v15, %v119_v17 }
  0xf0   :  { %v120_v20 = vld [vmem:[#allocation2 + $0x8] sm:$0xff] }
  0xf1   :  { %v134_v21 = vadd.f32 %v164_v16, %v128_v18  ;;  %v129_v22 = vadd.f32 %v157_v15, %v120_v20 }
  0xf3   :  { %v160_v23 = vpack.c.bf16 %v134_v21, %v134_v21  ;;  %v135_v24 = vadd.f32 %v165_v19, %v129_v22 }
  0xf5   :  { %145 = vst.msk [vmem:[%s252_s4] sm:$0xf] %vm144_vm3, %v160_v23  ;;  %v161_v25 = vpack.c.bf16 %v135_v24, %v135_v24 }
  0xf7   :  { %146 = vst.msk [vmem:[%s252_s4 + $0x4] sm:$0xf] %vm144_vm3, %v161_v25 }

// kernel: gpt_forward.21
= control target key start
LH: loop header
LB: loop body
LE: loop exit
PB: predicated region body
PF: predicated region fallthrough
CT: control target
= control target key end

     0   :  { %vm23_vm0 = vcmask 261120   ;;  %s385_s0 = inlined_call_operand.vmem [shape: bf16[16,32], index: 0, kind: input, shape index: {}]   ;;  %s386_s1 = inlined_call_operand.vmem [shape: f32[1,32], index: 1, kind: input, shape index: {}]   ;;  %s387_s2 = inlined_call_operand.vmem [shape: f32[1,32], index: 2, kind: input, shape index: {}]   ;;  %s388_s3 = inlined_call_operand.vmem [shape: bf16[128,32], index: 3, kind: input, shape index: {}]   ;;  %s389_s4 = inlined_call_operand.hbm [shape: f32[16,128], index: 4, kind: output, shape index: {}]  }
   0x1   :  { %v224_v0 = vld [vmem:[%s385_s0] sm:$0xff]  }
   0x2   :  { %v225_v1 = vunpack.c.l.bf16 %v224_v0  ;;  %v226_v2 = vunpack.c.h.bf16 %v224_v0 }
   0x4   :  { %v24_v3 = vsel %vm23_vm0, %v225_v1, 0.0  ;;  %v27_v4 = vsel %vm23_vm0, %v226_v2, 0.0 }
   0x5   :  { %25 = vadd.xlane.f32.xlu0 %v24_v3 }
   0x6   :  { %9 = vsyncpa [#allocation3], 0  ;;  %v261_v5 = vld [vmem:[%s388_s3] sm:$0xff]   ;;  %v297_v6 = vmov 0.0   ;;  %v262_v8 = vld [vmem:[%s388_s3 + $0x8] sm:$0xff]   ;;  %vm298_vm1 = vmmov 0  }
   0x7   :  { %236 = vmatprep.subr.bf16.mxu0 %v297_v6  ;;  %v130_v7 = vsel %vm23_vm0, %v261_v5, 0  ;;  %v133_v9 = vsel %vm23_vm0, %v262_v8, 0  ;;  %v263_v10 = vld [vmem:[%s388_s3 + $0x10] sm:$0xff]   ;;  %v264_v12 = vld [vmem:[%s388_s3 + $0x18] sm:$0xff]   ;;  %v265_v14 = vld [vmem:[%s388_s3 + $0x20] sm:$0xff]   ;;  %252 = vmatprep.mubr.msk.bf16.mxu0 %vm298_vm1, %v297_v6  ;;  %s299_s9 = smov [#allocation2]  }
   0x8   :  { %237 = vmatpush3.bf16.xpose.msra.mxu0 %v130_v7  ;;  %v136_v11 = vsel %vm23_vm0, %v263_v10, 0  ;;  %v139_v13 = vsel %vm23_vm0, %v264_v12, 0  ;;  %v142_v15 = vsel %vm23_vm0, %v265_v14, 0  ;;  %v266_v26 = vld [vmem:[%s388_s3 + $0x28] sm:$0xff]   ;;  %v267_v28 = vld [vmem:[%s388_s3 + $0x30] sm:$0xff]   ;;  %v268_v30 = vld [vmem:[%s388_s3 + $0x38] sm:$0xff]  }
   0x9   :  { %28 = vadd.xlane.f32.xlu0 %v27_v4  ;;  %238 = vmatprep.subr.bf16.mxu0 %v297_v6  ;;  %v145_v27 = vsel %vm23_vm0, %v266_v26, 0  ;;  %v148_v29 = vsel %vm23_vm0, %v267_v28, 0  ;;  %v151_v31 = vsel %vm23_vm0, %v268_v30, 0  ;;  %v212_v40 = vld [vmem:[%s386_s1] ss:$0 sm:$0xff]  ;;  %s201_s10 = sshll.u32 %s299_s9, 4  ;;  %s202_s10 = int_to_ptr.vmem [resolvable:$true] %s201_s10 }
   0xa   :  { %v213_v44 = vld [vmem:[%s387_s2] ss:$0 sm:$0xff]  ;;  %s273_s1 = scalar_lea.vmem %s202_s10, 256  ;;  %p278_p1 = scmp.lt.s32.totalorder %s202_s10, %s202_s10 }
   0xb   :  { %p274_p0 = scmp.ne.s32.totalorder %s202_s10, %s273_s1  ;;  %p279_p2 = scmp.lt.s32.totalorder %s273_s1, %s273_s1 }
   0xd   :  { %p280_p3 = por %p279_p2, %p278_p1 }
   0xf   :  { %p281_p4 = pnand %p280_p3, %p274_p0 }
  0x10   :  { %239 = vmatpush3.bf16.xpose.msra.mxu0 %v133_v9 }
  0x11   :  { %240 = vmatprep.subr.bf16.mxu0 %v297_v6 }
  0x18   :  { %241 = vmatpush3.bf16.xpose.msra.mxu0 %v136_v11 }
  0x19   :  { %242 = vmatprep.subr.bf16.mxu0 %v297_v6 }
  0x20   :  { %243 = vmatpush3.bf16.xpose.msra.mxu0 %v139_v13 }
  0x21   :  { %244 = vmatprep.subr.bf16.mxu0 %v297_v6 }
  0x28   :  { %245 = vmatpush3.bf16.xpose.msra.mxu0 %v142_v15 }
  0x29   :  { %246 = vmatprep.subr.bf16.mxu0 %v297_v6 }
  0x30   :  { %247 = vmatpush3.bf16.xpose.msra.mxu0 %v145_v27 }
  0x31   :  { %248 = vmatprep.subr.bf16.mxu0 %v297_v6 }
  0x38   :  { %249 = vmatpush3.bf16.xpose.msra.mxu0 %v148_v29 }
  0x39   :  { %250 = vmatprep.subr.bf16.mxu0 %v297_v6 }
  0x40   :  { %251 = vmatpush3.bf16.xpose.msra.mxu0 %v151_v31 }
  0x92   :  { %v26_v16 = vpop.xlane.xlu0 %25 }
  0x93   :  { %v31_v17 = vmul.f32 0.03125, %v26_v16 }
  0x95   :  { %v33_v18 = vsub.f32 %v225_v1, %v31_v17 }
  0x96   :  { %v29_v19 = vpop.xlane.xlu0 %28 }
  0x97   :  { %v32_v20 = vmul.f32 0.03125, %v29_v19  ;;  %v35_v21 = vmul.f32 %v33_v18, %v33_v18 }
  0x99   :  { %v34_v22 = vsub.f32 %v226_v2, %v32_v20  ;;  %v37_v23 = vsel %vm23_vm0, %v35_v21, 0.0 }
  0x9a   :  { %38 = vadd.xlane.f32.xlu1 %v37_v23 }
  0x9b   :  { %v36_v24 = vmul.f32 %v34_v22, %v34_v22 }
  0x9d   :  { %v40_v25 = vsel %vm23_vm0, %v36_v24, 0.0 }
  0x9e   :  { %41 = vadd.xlane.f32.xlu1 %v40_v25 }
 0x127   :  { %v39_v32 = vpop.xlane.xlu1 %38 }
 0x128   :  { %v43_v33 = vmul.f32 0.03125, %v39_v32 }
 0x12a   :  { %v45_v34 = vadd.f32 1e-05, %v43_v33 }
 0x12b   :  { %v42_v35 = vpop.xlane.xlu1 %41 }
 0x12c   :  { %269 = vrsqrt.f32 %v45_v34  ;;  %v44_v36 = vmul.f32 0.03125, %v42_v35 }
 0x12e   :  { %v46_v37 = vadd.f32 1e-05, %v44_v36 }
 0x130   :  { %271 = vrsqrt.f32 %v46_v37 }
 0x136   :  { %v270_v38 = vpop.eup %269 }
 0x137   :  { %v49_v39 = vmul.f32 %v270_v38, %v33_v18 }
 0x139   :  { %v58_v43 = vmul.f32 %v212_v40, %v49_v39 }
 0x13a   :  { %v272_v41 = vpop.eup %271 }
 0x13b   :  { %v50_v42 = vmul.f32 %v272_v41, %v34_v22  ;;  %v67_v46 = vadd.f32 %v213_v44, %v58_v43 }
 0x13d   :  { %v59_v45 = vmul.f32 %v212_v40, %v50_v42 }
 0x13f   :  { %v68_v47 = vadd.f32 %v213_v44, %v59_v45 }
 0x141   :  { %v69_v48 = vpack.c.bf16 %v68_v47, %v67_v46 }
 0x143   :  { %253 = vmatmul.mubr.msk.bf16.vlgmr.msra.gmra.mrb[0].mxu0 %vm23_vm0, %v69_v48 }
 0x216   :  { %v187_v49 = vpop.f32.mrb[0].mxu0 }
 0x217   :  { %194 = vst [vmem:[#allocation2] sm:$0xff] %v187_v49  ;;  %v254_v50 = vpop.f32.mrb[1].mxu0 }
 0x218   :  { %v190_v51 = vpop.f32.mrb[2].mxu0 }
 0x219   :  { %195 = vst [vmem:[#allocation2 + $0x8] sm:$0xff] %v190_v51  ;;  %v255_v52 = vpop.f32.mrb[3].mxu0 }
 0x21a   :  { %284 = shalt.err (!%p281_p4)
}
 0x21b   :  { %s285_s12 = scalar_lea.hbm %s389_s4, 256 }
 0x21c   :  { %p286_p5 = scmp.ne.s32.totalorder %s389_s4, %s285_s12  ;;  %p289_p6 = scmp.lt.u32.totalorder %s285_s12, %s389_s4 }
 0x21e   :  { %p291_p7 = pnand %p289_p6, %p286_p5 }
 0x220   :  { %294 = shalt.err (!%p291_p7)
}
 0x221   :  { %s300_s17 = smov 128   ;;  %s301_s18 = smov 8  }
 0x222   :  { %207 = dma.vmem_to_hbm [thread:$0]  %s202_s10, 256, %s389_s4, [#allocation3], %s300_s17, %s300_s17, %s301_s18  }
 0x223   :  { %295 = dma.done.wait [#allocation3], 256  }
 0x224   :  { %296 = vsyncadd [#allocation3], 4294967040 }
 0x225   :  { %211 = vsyncpa [#allocation3], 1 }

</bundles_post_ra>
